<compile_context>
chip_gen: v6e
topology: v6e:2x2x1
jax: 0.10.0
libtpu: 0.0.40
codegen_flags: <defaults>
</compile_context>

<pallas_src>
import functools

import jax
import jax.numpy as jnp
from jax.experimental import pallas as pl
from jax.experimental.pallas import tpu as pltpu

LN_EPS = 1e-5  # nn.LayerNorm default

# act_dict from the PyTorch module, in jnp form (selected statically).
_ACTS = {
    "relu": lambda x: jnp.maximum(x, 0.0),
    "sigmoid": jax.nn.sigmoid,
    "gelu": lambda x: jax.nn.gelu(x, approximate=False),
    "swish": lambda x: x * jax.nn.sigmoid(x),
}


def _round_up(n, m):
    return ((n + m - 1) // m) * m


def _mlp_kernel(x_ref, w2_ref, params_ref, b3_ref, o_ref, *, act):
    # x_ref:      (tile_b, I)   input rows, original (possibly bf16) dtype
    # w2_ref:     (I, H) f32    fc2 weight, pre-transposed, unpadded
    # params_ref: (4, H) f32    rows = [fc2.bias, ln.gamma, ln.beta, fc3.weight]
    # b3_ref:     (1, 1) SMEM   fc3 bias scalar
    # o_ref:      (tile_b, 1)   per-row scalar output
    x = act(x_ref[...].astype(jnp.float32))          # x.float(); act(x.T).T == act(x)
    h = jnp.dot(x, w2_ref[...], preferred_element_type=jnp.float32)   # MXU
    h = act(h + params_ref[0:1, :])                  # + fc2 bias, activation

    # LayerNorm over the hidden (lane) axis, all in f32.
    mean = jnp.mean(h, axis=-1, keepdims=True)
    cent = h - mean
    var = jnp.mean(cent * cent, axis=-1, keepdims=True)
    hn = cent * jax.lax.rsqrt(var + LN_EPS)          # rsqrt -> EUP
    hn = hn * params_ref[1:2, :] + params_ref[2:3, :]

    # fc3 (H -> 1): lane-wise multiply + lane reduction, plus SMEM scalar bias.
    o_ref[...] = (jnp.sum(hn * params_ref[3:4, :], axis=-1, keepdims=True)
                  + b3_ref[0, 0])


def _mlp_no_attention_forward(x, w2, b2, gamma, beta, w3, b3, *, act="relu"):
    """x: (B, mlp_input_size) -> (B,) float32.

    w2: (I, H) fc2 weight pre-transposed; b2/gamma/beta/w3: (H,); b3: scalar.
    x is streamed in its incoming dtype (no wrapper cast); math is f32.
    """
    act_fn = _ACTS[act]
    B, I = x.shape
    H = w2.shape[1]
    itemsize = jnp.dtype(x.dtype).itemsize

    # Row tile: as large as the VMEM budget allows (mem-bound roofline), but at
    # most ~B/2 so the 1-D parallel grid has >=2 steps for v7x's 2 TensorCores.
    cap = 1024 if itemsize <= 2 else 512
    half_b = _round_up(-(-B // 2), 8)
    tile_b = max(8, min(cap, half_b))
    B_pad = _round_up(B, tile_b)
    grid = (B_pad // tile_b,)

    # Only the batch dim is (possibly) padded; allow_input_fusion on operand 0
    # lets XLA fuse this pad into the pallas input rather than copying x.
    x_p = x if B_pad == B else jnp.pad(x, ((0, B_pad - B), (0, 0)))
    w2_p = w2.astype(jnp.float32)
    params = jnp.stack([b2, gamma, beta, w3]).astype(jnp.float32)      # (4, H)
    b3_s = jnp.reshape(b3, (1, 1)).astype(jnp.float32)                 # SMEM scalar

    # VMEM: double-buffered x tile + double-buffered (grid-invariant) w2 + slack.
    need = 2 * tile_b * I * itemsize + 2 * I * H * 4 + (4 << 20)
    vmem_limit = int(min(max(need, 32 << 20), 48 << 20))

    n_transc = 0 if act == "relu" else B_pad * (I + H)
    cost = pl.CostEstimate(
        flops=2 * B_pad * I * H + 12 * B_pad * H,
        transcendentals=n_transc,
        bytes_accessed=B_pad * I * itemsize + I * H * 4 + 4 * H * 4
        + B_pad * 4 + 4,
    )

    out = pl.pallas_call(
        functools.partial(_mlp_kernel, act=act_fn),
        out_shape=jax.ShapeDtypeStruct((B_pad, 1), jnp.float32),
        grid=grid,
        in_specs=[
            pl.BlockSpec((tile_b, I), lambda i: (i, 0)),       # x row tile, full width
            pl.BlockSpec((I, H), lambda i: (0, 0)),            # fc2 weight (invariant)
            pl.BlockSpec((4, H), lambda i: (0, 0)),            # fused params (invariant)
            pl.BlockSpec(memory_space=pltpu.MemorySpace.SMEM), # fc3 bias scalar
        ],
        out_specs=pl.BlockSpec((tile_b, 1), lambda i: (i, 0)),
        compiler_params=pltpu.CompilerParams(
            dimension_semantics=("parallel",),
            allow_input_fusion=[True, False, False, False],
            vmem_limit_bytes=vmem_limit,
        ),
        cost_estimate=cost,
    )(x_p, w2_p, params, b3_s)
    return out[:B, 0]


mlp_no_attention_forward = jax.jit(_mlp_no_attention_forward,
                                   static_argnames=("act",))


def _reference(x, w2, b2, gamma, beta, w3, b3, act):
    act_fn = _ACTS[act]
    xa = act_fn(x.astype(jnp.float32))
    h = act_fn(jnp.dot(xa, w2.astype(jnp.float32),
                       precision=jax.lax.Precision.HIGHEST) + b2)
    mean = h.mean(-1, keepdims=True)
    var = ((h - mean) ** 2).mean(-1, keepdims=True)
    hn = (h - mean) / jnp.sqrt(var + LN_EPS) * gamma + beta
    return jnp.dot(hn, w3, precision=jax.lax.Precision.HIGHEST) + b3


if __name__ == "__main__":
    # mlp_input_size is hardwired to 4781 in the module's __init__;
    # mlp_hidden_size / mlp_hidden_act come from an external config -> kept small.
    B, I, H = 2, 4781, 64
    ACT = "relu"  # TODO(synk): config.NET_MLP['mlp_hidden_act'] is external config; defaulting to 'relu'.

    key = jax.random.PRNGKey(0)
    ks = jax.random.split(key, 6)

    x = jax.random.normal(ks[0], (B, I), dtype=jnp.float32)

    # Parameters (deterministic init, roughly matching PyTorch Linear uniform init).
    lim2 = 1.0 / (I ** 0.5)
    w2 = jax.random.uniform(ks[1], (I, H), jnp.float32, -lim2, lim2)   # fc2.weight.T
    b2 = jax.random.uniform(ks[2], (H,), jnp.float32, -lim2, lim2)     # fc2.bias
    gamma = jnp.ones((H,), jnp.float32)                                # ln.weight
    beta = jnp.zeros((H,), jnp.float32)                                # ln.bias
    lim3 = 1.0 / (H ** 0.5)
    w3 = jax.random.uniform(ks[3], (H,), jnp.float32, -lim3, lim3)     # fc3.weight
    b3 = jax.random.uniform(ks[4], (), jnp.float32, -lim3, lim3)       # fc3.bias

    y = mlp_no_attention_forward(x, w2, b2, gamma, beta, w3, b3, act=ACT)
    jax.block_until_ready(y)

    y_ref = _reference(x, w2, b2, gamma, beta, w3, b3, ACT)
    assert y.shape == (B,)
    assert jnp.allclose(y, y_ref, atol=2e-3, rtol=2e-3), (y, y_ref)

    print("KERNEL_OK")
</pallas_src>

<mosaic_0001>
module attributes {stable_mosaic.version = 11 : i64} {
  func.func @_mlp_kernel(%arg0: i32, %arg1: memref<8x4781xf32, #tpu.memory_space<vmem>>, %arg2: memref<4781x64xf32, #tpu.memory_space<vmem>>, %arg3: memref<4x64xf32, #tpu.memory_space<vmem>>, %arg4: memref<1x1xf32, #tpu.memory_space<smem>>, %arg5: memref<8x1xf32, #tpu.memory_space<vmem>>) attributes {dimension_semantics = [#tpu.dimension_semantics<parallel>], iteration_bounds = array<i64: 1>, scalar_prefetch = 0 : i64, scratch_operands = 0 : i64, tpu.core_type = #tpu.core_type<tc>, window_params = [{transform_indices = @transform_0, window_bounds = array<i64: 8, 4781>}, {pipeline_mode = #tpu.pipeline_mode<synchronous>, transform_indices = @transform_1, window_bounds = array<i64: 4781, 64>}, {pipeline_mode = #tpu.pipeline_mode<synchronous>, transform_indices = @transform_2, window_bounds = array<i64: 4, 64>}, {transform_indices = @transform_3, window_bounds = array<i64: 1, 1>}, {transform_indices = @transform_4, window_bounds = array<i64: 8, 1>}]} {
    %c0 = arith.constant 0 : index
    %c0_0 = arith.constant 0 : index
    %0 = vector.load %arg1[%c0, %c0_0] : memref<8x4781xf32, #tpu.memory_space<vmem>>, vector<8x4781xf32>
    %cst = arith.constant 0.000000e+00 : f32
    %1 = vector.broadcast %cst : f32 to vector<8x4781xf32>
    %2 = arith.maximumf %0, %1 : vector<8x4781xf32>
    %c0_1 = arith.constant 0 : index
    %c0_2 = arith.constant 0 : index
    %3 = vector.load %arg2[%c0_1, %c0_2] : memref<4781x64xf32, #tpu.memory_space<vmem>>, vector<4781x64xf32>
    %cst_3 = arith.constant dense<0.000000e+00> : vector<8x64xf32>
    %4 = tpu.matmul %2, %3, %cst_3 {dimension_numbers = #tpu.dot_dimension_numbers<[1], [0], [0], [1], [0, 0, 1, 1], [], []>} : vector<8x4781xf32>, vector<4781x64xf32>, vector<8x64xf32> -> vector<8x64xf32>
    %c0_4 = arith.constant 0 : index
    %c0_5 = arith.constant 0 : index
    %5 = vector.load %arg3[%c0_4, %c0_5] : memref<4x64xf32, #tpu.memory_space<vmem>>, vector<1x64xf32>
    %6 = vector.broadcast %5 : vector<1x64xf32> to vector<8x64xf32>
    %7 = arith.addf %4, %6 : vector<8x64xf32>
    %cst_6 = arith.constant 0.000000e+00 : f32
    %8 = vector.broadcast %cst_6 : f32 to vector<8x64xf32>
    %9 = arith.maximumf %7, %8 : vector<8x64xf32>
    %cst_7 = arith.constant dense<0.000000e+00> : vector<8xf32>
    %10 = vector.multi_reduction <add>, %9, %cst_7 [1] : vector<8x64xf32> to vector<8xf32>
    %11 = vector.shape_cast %10 : vector<8xf32> to vector<8x1xf32>
    %cst_8 = arith.constant 6.400000e+01 : f32
    %12 = vector.broadcast %cst_8 : f32 to vector<8x1xf32>
    %13 = arith.divf %11, %12 : vector<8x1xf32>
    %14 = vector.broadcast %13 : vector<8x1xf32> to vector<8x64xf32>
    %15 = arith.subf %9, %14 : vector<8x64xf32>
    %16 = arith.mulf %15, %15 : vector<8x64xf32>
    %cst_9 = arith.constant dense<0.000000e+00> : vector<8xf32>
    %17 = vector.multi_reduction <add>, %16, %cst_9 [1] : vector<8x64xf32> to vector<8xf32>
    %18 = vector.shape_cast %17 : vector<8xf32> to vector<8x1xf32>
    %cst_10 = arith.constant 6.400000e+01 : f32
    %19 = vector.broadcast %cst_10 : f32 to vector<8x1xf32>
    %20 = arith.divf %18, %19 : vector<8x1xf32>
    %cst_11 = arith.constant 9.99999974E-6 : f32
    %21 = vector.broadcast %cst_11 : f32 to vector<8x1xf32>
    %22 = arith.addf %20, %21 : vector<8x1xf32>
    %23 = math.rsqrt %22 : vector<8x1xf32>
    %24 = vector.broadcast %23 : vector<8x1xf32> to vector<8x64xf32>
    %25 = arith.mulf %15, %24 : vector<8x64xf32>
    %c1 = arith.constant 1 : index
    %c0_12 = arith.constant 0 : index
    %26 = vector.load %arg3[%c1, %c0_12] : memref<4x64xf32, #tpu.memory_space<vmem>>, vector<1x64xf32>
    %27 = vector.broadcast %26 : vector<1x64xf32> to vector<8x64xf32>
    %28 = arith.mulf %25, %27 : vector<8x64xf32>
    %c2 = arith.constant 2 : index
    %c0_13 = arith.constant 0 : index
    %29 = vector.load %arg3[%c2, %c0_13] : memref<4x64xf32, #tpu.memory_space<vmem>>, vector<1x64xf32>
    %30 = vector.broadcast %29 : vector<1x64xf32> to vector<8x64xf32>
    %31 = arith.addf %28, %30 : vector<8x64xf32>
    %c3 = arith.constant 3 : index
    %c0_14 = arith.constant 0 : index
    %32 = vector.load %arg3[%c3, %c0_14] : memref<4x64xf32, #tpu.memory_space<vmem>>, vector<1x64xf32>
    %33 = vector.broadcast %32 : vector<1x64xf32> to vector<8x64xf32>
    %34 = arith.mulf %31, %33 : vector<8x64xf32>
    %cst_15 = arith.constant dense<0.000000e+00> : vector<8xf32>
    %35 = vector.multi_reduction <add>, %34, %cst_15 [1] : vector<8x64xf32> to vector<8xf32>
    %36 = vector.shape_cast %35 : vector<8xf32> to vector<8x1xf32>
    %c0_16 = arith.constant 0 : index
    %c0_17 = arith.constant 0 : index
    %37 = memref.load %arg4[%c0_16, %c0_17] : memref<1x1xf32, #tpu.memory_space<smem>>
    %38 = vector.broadcast %37 : f32 to vector<8x1xf32>
    %39 = arith.addf %36, %38 : vector<8x1xf32>
    %c0_18 = arith.constant 0 : index
    %c0_19 = arith.constant 0 : index
    %40 = vector.load %arg5[%c0_18, %c0_19] : memref<8x1xf32, #tpu.memory_space<vmem>>, vector<8x1xf32>
    tpu.vector_store %arg5[%c0_18, %c0_19], %39 {strides = array<i32>} : memref<8x1xf32, #tpu.memory_space<vmem>>, vector<8x1xf32>,
    return
  }
  func.func @transform_0(%arg0: i32) -> (i32, i32) {
    %c0_i32 = arith.constant 0 : i32
    %c0_i32_0 = arith.constant 0 : i32
    return %arg0, %c0_i32 : i32, i32
  }
  func.func @transform_1(%arg0: i32) -> (i32, i32) {
    %c0_i32 = arith.constant 0 : i32
    %c0_i32_0 = arith.constant 0 : i32
    %c0_i32_1 = arith.constant 0 : i32
    return %c0_i32, %c0_i32_0 : i32, i32
  }
  func.func @transform_2(%arg0: i32) -> (i32, i32) {
    %c0_i32 = arith.constant 0 : i32
    %c0_i32_0 = arith.constant 0 : i32
    %c0_i32_1 = arith.constant 0 : i32
    return %c0_i32, %c0_i32_0 : i32, i32
  }
  func.func @transform_3(%arg0: i32) -> (i32, i32) {
    %c0_i32 = arith.constant 0 : i32
    %c0_i32_0 = arith.constant 0 : i32
    %c0_i32_1 = arith.constant 0 : i32
    return %c0_i32, %c0_i32_0 : i32, i32
  }
  func.func @transform_4(%arg0: i32) -> (i32, i32) {
    %c0_i32 = arith.constant 0 : i32
    %c0_i32_0 = arith.constant 0 : i32
    return %arg0, %c0_i32 : i32, i32
  }
}

</mosaic_0001>

<bundles_post_ra>
// kernel: _mlp_no_attention_forward.2
= control target key start
LH: loop header
LB: loop body
LE: loop exit
PB: predicated region body
PF: predicated region fallthrough
CT: control target
= control target key end

     0   :  { %v21_v7 = vlaneseq  ;;  %vm1309_vm1 = vcmask 1044480   ;;  %vm1305_vm3 = vcmask 367616   ;;  %vm2644_vm4 = vcmask 523264   ;;  %s5472_s0 = inlined_call_operand.vmem [shape: f32[4781,64], index: 0, kind: input, shape index: {}]   ;;  %s5473_s1 = inlined_call_operand.vmem [shape: f32[4,64], index: 1, kind: input, shape index: {}]   ;;  %s5474_s2 = inlined_call_operand.<no memory space> [shape: f32[1,1], index: 2, kind: input, shape index: {}]   ;;  %s5475_s3 = inlined_call_operand.vmem [shape: f32[2,4781], index: 3, kind: input, shape index: {}]   ;;  %s5476_s4 = inlined_call_operand.<no memory space> [shape: f32[], index: 4, kind: input, shape index: {}]   ;;  %s5477_s5 = inlined_call_operand.vmem [shape: f32[8,1], index: 5, kind: output, shape index: {}]  }
   0x1   :  { %v3399_v0 = vstv %s5476_s4  ;;  %v733_v1 = vld [vmem:[%s5472_s0 + $0xf8] sm:$0xff]  ;;  %v732_v3 = vld [vmem:[%s5472_s0 + $0xf0] sm:$0xff]  ;;  %v731_v5 = vld [vmem:[%s5472_s0 + $0xe8] sm:$0xff]  ;;  %vm2683_vm5 = vcmask 7168  }
   0x2   :  { %v717_v2 = vld [vmem:[%s5472_s0 + $0x78] sm:$0xff]  ;;  %2732 = vmatprep.subr.mxu1 %v733_v1  ;;  %v716_v4 = vld [vmem:[%s5472_s0 + $0x70] sm:$0xff]  ;;  %v715_v6 = vld [vmem:[%s5472_s0 + $0x68] sm:$0xff]  ;;  %v3432_v12 = vshrl.u32 %v21_v7, 7 }
   0x3   :  { %2733 = vmatpush3.msra.mxu1 %v717_v2  ;;  %v730_v8 = vld [vmem:[%s5472_s0 + $0xe0] sm:$0xff]  ;;  %v729_v10 = vld [vmem:[%s5472_s0 + $0xd8] sm:$0xff]  ;;  %v728_v13 = vld [vmem:[%s5472_s0 + $0xd0] sm:$0xff] }
   0x4   :  { %2734 = vmatprep.subr.mxu1 %v732_v3  ;;  %v714_v9 = vld [vmem:[%s5472_s0 + $0x60] sm:$0xff]  ;;  %v713_v11 = vld [vmem:[%s5472_s0 + $0x58] sm:$0xff]  ;;  %v712_v15 = vld [vmem:[%s5472_s0 + $0x50] sm:$0xff]  ;;  %vm24_vm0 = vcmp.lt.s32.totalorder %v3432_v12, 2 }
   0x5   :  { %2735 = vmatpush3.msra.mxu1 %v716_v4  ;;  %v797_v14 = vld [vmem:[%s5472_s0 + $0x2f8] sm:$0xff]  ;;  %v796_v17 = vld [vmem:[%s5472_s0 + $0x2f0] sm:$0xff]  ;;  %v727_v18 = vld [vmem:[%s5472_s0 + $0xc8] sm:$0xff] }
   0x6   :  { %2736 = vmatprep.subr.mxu1 %v731_v5  ;;  %2802 = vmatprep.subr.mxu0 %v797_v14  ;;  %v781_v16 = vld [vmem:[%s5472_s0 + $0x278] sm:$0xff]  ;;  %v780_v19 = vld [vmem:[%s5472_s0 + $0x270] sm:$0xff]  ;;  %v711_v20 = vld [vmem:[%s5472_s0 + $0x48] sm:$0xff] }
   0x7   :  { %2737 = vmatpush3.msra.mxu1 %v715_v6  ;;  %2803 = vmatpush3.msra.mxu0 %v781_v16  ;;  %v795_v21 = vld [vmem:[%s5472_s0 + $0x2e8] sm:$0xff]  ;;  %v726_v23 = vld [vmem:[%s5472_s0 + $0xc0] sm:$0xff]  ;;  %v725_v28 = vld [vmem:[%s5472_s0 + $0xb8] sm:$0xff] }
   0x8   :  { %2738 = vmatprep.subr.mxu1 %v730_v8  ;;  %2804 = vmatprep.subr.mxu0 %v796_v17  ;;  %v779_v22 = vld [vmem:[%s5472_s0 + $0x268] sm:$0xff]  ;;  %v794_v24 = vld [vmem:[%s5472_s0 + $0x2e0] sm:$0xff]  ;;  %v709_v30 = vld [vmem:[%s5472_s0 + $0x38] sm:$0xff] }
   0x9   :  { %2739 = vmatpush3.msra.mxu1 %v714_v9  ;;  %2805 = vmatpush3.msra.mxu0 %v780_v19  ;;  %v710_v25 = vld [vmem:[%s5472_s0 + $0x40] sm:$0xff]  ;;  %v793_v32 = vld [vmem:[%s5472_s0 + $0x2d8] sm:$0xff]  ;;  %v724_v33 = vld [vmem:[%s5472_s0 + $0xb0] sm:$0xff] }
   0xa   :  { %2740 = vmatprep.subr.mxu1 %v729_v10  ;;  %2806 = vmatprep.subr.mxu0 %v795_v21  ;;  %v2689_v26 = vld [vmem:[%s5475_s3 + $0x2] sm:$0x3]  ;;  %v777_v34 = vld [vmem:[%s5472_s0 + $0x258] sm:$0xff]  ;;  %v708_v35 = vld [vmem:[%s5472_s0 + $0x30] sm:$0xff] }
   0xb   :  { %2741 = vmatpush3.msra.mxu1 %v713_v11  ;;  %v778_v27 = vld [vmem:[%s5472_s0 + $0x260] sm:$0xff]  ;;  %2807 = vmatpush3.msra.mxu0 %v779_v22  ;;  %v40_v29 = vsel %vm24_vm0, %v2689_v26, %v3399_v0  ;;  %v792_v36 = vld [vmem:[%s5472_s0 + $0x2d0] sm:$0xff]  ;;  %v723_v37 = vld [vmem:[%s5472_s0 + $0xa8] sm:$0xff] }
   0xc   :  { %2742 = vmatprep.subr.mxu1 %v728_v13  ;;  %2808 = vmatprep.subr.mxu0 %v794_v24  ;;  %v665_v31 = vmax.f32 %v40_v29, 0.0  ;;  %v776_v38 = vld [vmem:[%s5472_s0 + $0x250] sm:$0xff]  ;;  %v707_v39 = vld [vmem:[%s5472_s0 + $0x28] sm:$0xff]  ;;  %v722_v41 = vld [vmem:[%s5472_s0 + $0xa0] sm:$0xff] }
   0xd   :  { %2743 = vmatpush3.msra.mxu1 %v712_v15  ;;  %2809 = vmatpush3.msra.mxu0 %v778_v27  ;;  %v791_v40 = vld [vmem:[%s5472_s0 + $0x2c8] sm:$0xff]  ;;  %v706_v43 = vld [vmem:[%s5472_s0 + $0x20] sm:$0xff]  ;;  %v721_v45 = vld [vmem:[%s5472_s0 + $0x98] sm:$0xff] }
   0xe   :  { %2744 = vmatprep.subr.mxu1 %v727_v18  ;;  %1377 = vmatprep.mubr.f32.mxu1 %v665_v31  ;;  %v775_v42 = vld [vmem:[%s5472_s0 + $0x248] sm:$0xff]  ;;  %v790_v44 = vld [vmem:[%s5472_s0 + $0x2c0] sm:$0xff]  ;;  %v705_v47 = vld [vmem:[%s5472_s0 + $0x18] sm:$0xff] }
   0xf   :  { %2745 = vmatpush3.msra.mxu1 %v711_v20  ;;  %2810 = vmatprep.subr.mxu0 %v793_v32  ;;  %v774_v46 = vld [vmem:[%s5472_s0 + $0x240] sm:$0xff]  ;;  %v789_v49 = vld [vmem:[%s5472_s0 + $0x2b8] sm:$0xff]  ;;  %v720_v50 = vld [vmem:[%s5472_s0 + $0x90] sm:$0xff] }
  0x10   :  { %2746 = vmatprep.subr.mxu1 %v726_v23  ;;  %2811 = vmatpush3.msra.mxu0 %v777_v34  ;;  %v20_v48 = vld [vmem:[%s5475_s3] sm:$0x3]  ;;  %v773_v51 = vld [vmem:[%s5472_s0 + $0x238] sm:$0xff]  ;;  %v704_v52 = vld [vmem:[%s5472_s0 + $0x10] sm:$0xff] }
  0x11   :  { %2747 = vmatpush3.msra.mxu1 %v710_v25  ;;  %2812 = vmatprep.subr.mxu0 %v792_v36  ;;  %v788_v53 = vld [vmem:[%s5472_s0 + $0x2b0] sm:$0xff]  ;;  %v719_v54 = vld [vmem:[%s5472_s0 + $0x88] sm:$0xff]  ;;  %v25_v55 = vsel %vm24_vm0, %v20_v48, %v3399_v0  ;;  %v718_v59 = vld [vmem:[%s5472_s0 + $0x80] sm:$0xff] }
  0x12   :  { %2748 = vmatprep.subr.mxu1 %v725_v28  ;;  %2813 = vmatpush3.msra.mxu0 %v776_v38  ;;  %v772_v56 = vld [vmem:[%s5472_s0 + $0x230] sm:$0xff]  ;;  %v703_v57 = vld [vmem:[%s5472_s0 + $0x8] sm:$0xff]  ;;  %v702_v61 = vld [vmem:[%s5472_s0] sm:$0xff]  ;;  %v664_v62 = vmax.f32 %v25_v55, 0.0 }
  0x13   :  { %2749 = vmatpush3.msra.mxu1 %v709_v30  ;;  %2814 = vmatprep.subr.mxu0 %v791_v40  ;;  %v787_v58 = vld [vmem:[%s5472_s0 + $0x2a8] sm:$0xff]  ;;  %v786_v63 = vld [vmem:[%s5472_s0 + $0x2a0] sm:$0xff]  ;;  %v765_v1 = vld [vmem:[%s5472_s0 + $0x1f8] sm:$0xff] }
  0x14   :  { %2750 = vmatprep.subr.mxu1 %v724_v33  ;;  %2815 = vmatpush3.msra.mxu0 %v775_v42  ;;  %v771_v60 = vld [vmem:[%s5472_s0 + $0x228] sm:$0xff]  ;;  %v749_v2 = vld [vmem:[%s5472_s0 + $0x178] sm:$0xff]  ;;  %v770_v3 = vld [vmem:[%s5472_s0 + $0x220] sm:$0xff] }
  0x15   :  { %2751 = vmatpush3.msra.mxu1 %v708_v35  ;;  %2816 = vmatprep.subr.mxu0 %v790_v44  ;;  %v764_v4 = vld [vmem:[%s5472_s0 + $0x1f0] sm:$0xff]  ;;  %v785_v5 = vld [vmem:[%s5472_s0 + $0x298] sm:$0xff]  ;;  %v2693_v9 = vld [vmem:[%s5475_s3 + $0xa] sm:$0x3] }
  0x16   :  { %2752 = vmatprep.subr.mxu1 %v723_v37  ;;  %2817 = vmatpush3.msra.mxu0 %v774_v46  ;;  %v748_v6 = vld [vmem:[%s5472_s0 + $0x170] sm:$0xff]  ;;  %v769_v8 = vld [vmem:[%s5472_s0 + $0x218] sm:$0xff]  ;;  %v763_v10 = vld [vmem:[%s5472_s0 + $0x1e8] sm:$0xff]  ;;  %v104_v18 = vsel %vm24_vm0, %v2693_v9, %v3399_v0 }
  0x17   :  { %2753 = vmatpush3.msra.mxu1 %v707_v39  ;;  %2818 = vmatprep.subr.mxu0 %v789_v49  ;;  %v784_v11 = vld [vmem:[%s5472_s0 + $0x290] sm:$0xff]  ;;  %v747_v13 = vld [vmem:[%s5472_s0 + $0x168] sm:$0xff]  ;;  %v762_v16 = vld [vmem:[%s5472_s0 + $0x1e0] sm:$0xff]  ;;  %v669_v26 = vmax.f32 %v104_v18, 0.0 }
  0x18   :  { %2754 = vmatprep.subr.mxu1 %v722_v41  ;;  %2819 = vmatpush3.msra.mxu0 %v773_v51  ;;  %v768_v14 = vld [vmem:[%s5472_s0 + $0x210] sm:$0xff]  ;;  %v2692_v15 = vld [vmem:[%s5475_s3 + $0x8] sm:$0x3]  ;;  %v746_v19 = vld [vmem:[%s5472_s0 + $0x160] sm:$0xff] }
  0x19   :  { %2755 = vmatpush3.msra.mxu1 %v706_v43  ;;  %2820 = vmatprep.subr.mxu0 %v788_v53  ;;  %v783_v17 = vld [vmem:[%s5472_s0 + $0x288] sm:$0xff]  ;;  %v761_v21 = vld [vmem:[%s5472_s0 + $0x1d8] sm:$0xff]  ;;  %v782_v22 = vld [vmem:[%s5472_s0 + $0x280] sm:$0xff]  ;;  %v88_v23 = vsel %vm24_vm0, %v2692_v15, %v3399_v0 }
  0x1a   :  { %2756 = vmatprep.subr.mxu1 %v721_v45  ;;  %2821 = vmatpush3.msra.mxu0 %v772_v56  ;;  %v767_v20 = vld [vmem:[%s5472_s0 + $0x208] sm:$0xff]  ;;  %v745_v24 = vld [vmem:[%s5472_s0 + $0x158] sm:$0xff]  ;;  %v766_v25 = vld [vmem:[%s5472_s0 + $0x200] sm:$0xff]  ;;  %v668_v30 = vmax.f32 %v88_v23, 0.0 }
  0x1b   :  { %2757 = vmatpush3.msra.mxu1 %v705_v47  ;;  %2822 = vmatprep.subr.mxu0 %v787_v58  ;;  %v760_v27 = vld [vmem:[%s5472_s0 + $0x1d0] sm:$0xff]  ;;  %v861_v29 = vld [vmem:[%s5472_s0 + $0x4f8] sm:$0xff]  ;;  %v759_v31 = vld [vmem:[%s5472_s0 + $0x1c8] sm:$0xff] }
  0x1c   :  { %2758 = vmatprep.subr.mxu1 %v720_v50  ;;  %2823 = vmatpush3.msra.mxu0 %v771_v60  ;;  %v744_v28 = vld [vmem:[%s5472_s0 + $0x150] sm:$0xff]  ;;  %v2691_v32 = vld [vmem:[%s5475_s3 + $0x6] sm:$0x3]  ;;  %v743_v33 = vld [vmem:[%s5472_s0 + $0x148] sm:$0xff] }
  0x1d   :  { %2759 = vmatpush3.msra.mxu1 %v704_v52  ;;  %2824 = vmatprep.subr.mxu0 %v786_v63  ;;  %v845_v34 = vld [vmem:[%s5472_s0 + $0x478] sm:$0xff]  ;;  %v758_v35 = vld [vmem:[%s5472_s0 + $0x1c0] sm:$0xff]  ;;  %v860_v36 = vld [vmem:[%s5472_s0 + $0x4f0] sm:$0xff]  ;;  %v72_v39 = vsel %vm24_vm0, %v2691_v32, %v3399_v0 }
  0x1e   :  { %2760 = vmatprep.subr.mxu1 %v719_v54  ;;  %2825 = vmatpush3.msra.mxu0 %v770_v3  ;;  %v742_v37 = vld [vmem:[%s5472_s0 + $0x140] sm:$0xff]  ;;  %v844_v38 = vld [vmem:[%s5472_s0 + $0x470] sm:$0xff]  ;;  %v757_v40 = vld [vmem:[%s5472_s0 + $0x1b8] sm:$0xff]  ;;  %v667_v46 = vmax.f32 %v72_v39, 0.0 }
  0x1f   :  { %2761 = vmatpush3.msra.mxu1 %v703_v57  ;;  %2826 = vmatprep.subr.mxu0 %v785_v5  ;;  %v859_v41 = vld [vmem:[%s5472_s0 + $0x4e8] sm:$0xff]  ;;  %v741_v42 = vld [vmem:[%s5472_s0 + $0x138] sm:$0xff]  ;;  %v756_v44 = vld [vmem:[%s5472_s0 + $0x1b0] sm:$0xff] }
  0x20   :  { %2762 = vmatprep.subr.mxu1 %v718_v59  ;;  %2827 = vmatpush3.msra.mxu0 %v769_v8  ;;  %v843_v43 = vld [vmem:[%s5472_s0 + $0x468] sm:$0xff]  ;;  %v858_v45 = vld [vmem:[%s5472_s0 + $0x4e0] sm:$0xff]  ;;  %v740_v47 = vld [vmem:[%s5472_s0 + $0x130] sm:$0xff] }
  0x21   :  { %2763 = vmatpush3.msra.mxu1 %v702_v61  ;;  %2828 = vmatprep.subr.mxu0 %v784_v11  ;;  %v755_v48 = vld [vmem:[%s5472_s0 + $0x1a8] sm:$0xff]  ;;  %v842_v49 = vld [vmem:[%s5472_s0 + $0x460] sm:$0xff]  ;;  %v857_v51 = vld [vmem:[%s5472_s0 + $0x4d8] sm:$0xff] }
  0x22   :  { %1378 = vmatmul.mubr.f32.vlgmr.msra.gmra.mxu1 %v664_v62  ;;  %2767 = vmatprep.subr.mxu1 %v765_v1  ;;  %v739_v50 = vld [vmem:[%s5472_s0 + $0x128] sm:$0xff]  ;;  %v754_v52 = vld [vmem:[%s5472_s0 + $0x1a0] sm:$0xff]  ;;  %v841_v53 = vld [vmem:[%s5472_s0 + $0x458] sm:$0xff] }
  0x23   :  { %2768 = vmatpush3.msra.mxu1 %v749_v2  ;;  %2829 = vmatpush3.msra.mxu0 %v768_v14  ;;  %v738_v54 = vld [vmem:[%s5472_s0 + $0x120] sm:$0xff]  ;;  %v856_v55 = vld [vmem:[%s5472_s0 + $0x4d0] sm:$0xff]  ;;  %v753_v56 = vld [vmem:[%s5472_s0 + $0x198] sm:$0xff] }
  0x24   :  { %2769 = vmatprep.subr.mxu1 %v764_v4  ;;  %2830 = vmatprep.subr.mxu0 %v783_v17  ;;  %v840_v57 = vld [vmem:[%s5472_s0 + $0x450] sm:$0xff]  ;;  %v737_v58 = vld [vmem:[%s5472_s0 + $0x118] sm:$0xff]  ;;  %v2690_v59 = vld [vmem:[%s5475_s3 + $0x4] sm:$0x3] }
  0x25   :  { %2770 = vmatpush3.msra.mxu1 %v748_v6  ;;  %2831 = vmatpush3.msra.mxu0 %v767_v20  ;;  %v855_v60 = vld [vmem:[%s5472_s0 + $0x4c8] sm:$0xff]  ;;  %v752_v61 = vld [vmem:[%s5472_s0 + $0x190] sm:$0xff]  ;;  %v854_v1 = vld [vmem:[%s5472_s0 + $0x4c0] sm:$0xff]  ;;  %v56_v3 = vsel %vm24_vm0, %v2690_v59, %v3399_v0 }
  0x26   :  { %2771 = vmatprep.subr.mxu1 %v763_v10  ;;  %2832 = vmatprep.subr.mxu0 %v782_v22  ;;  %v839_v62 = vld [vmem:[%s5472_s0 + $0x448] sm:$0xff]  ;;  %v736_v63 = vld [vmem:[%s5472_s0 + $0x110] sm:$0xff]  ;;  %v838_v4 = vld [vmem:[%s5472_s0 + $0x440] sm:$0xff]  ;;  %v666_v11 = vmax.f32 %v56_v3, 0.0 }
  0x27   :  { %2772 = vmatpush3.msra.mxu1 %v747_v13  ;;  %2833 = vmatpush3.msra.mxu0 %v766_v25  ;;  %v751_v2 = vld [vmem:[%s5472_s0 + $0x188] sm:$0xff]  ;;  %v853_v6 = vld [vmem:[%s5472_s0 + $0x4b8] sm:$0xff]  ;;  %v750_v8 = vld [vmem:[%s5472_s0 + $0x180] sm:$0xff] }
  0x28   :  { %2773 = vmatprep.subr.mxu1 %v762_v16  ;;  %1517 = vmatprep.mubr.f32.mxu0 %v669_v26  ;;  %v735_v5 = vld [vmem:[%s5472_s0 + $0x108] sm:$0xff]  ;;  %v837_v9 = vld [vmem:[%s5472_s0 + $0x438] sm:$0xff]  ;;  %v734_v10 = vld [vmem:[%s5472_s0 + $0x100] sm:$0xff] }
  0x29   :  { %2774 = vmatpush3.msra.mxu1 %v746_v19  ;;  %2872 = vmatprep.subr.mxu0 %v861_v29  ;;  %v852_v13 = vld [vmem:[%s5472_s0 + $0x4b0] sm:$0xff]  ;;  %v829_v14 = vld [vmem:[%s5472_s0 + $0x3f8] sm:$0xff]  ;;  %v851_v18 = vld [vmem:[%s5472_s0 + $0x4a8] sm:$0xff] }
  0x2a   :  { %2775 = vmatprep.subr.mxu1 %v761_v21  ;;  %1518 = vmatmul.mubr.f32.vlgmr.msra.gmra.mxu0 %v668_v30  ;;  %v813_v15 = vld [vmem:[%s5472_s0 + $0x378] sm:$0xff]  ;;  %v836_v16 = vld [vmem:[%s5472_s0 + $0x430] sm:$0xff]  ;;  %v835_v20 = vld [vmem:[%s5472_s0 + $0x428] sm:$0xff] }
  0x2b   :  { %2776 = vmatpush3.msra.mxu1 %v745_v24  ;;  %2873 = vmatpush3.msra.mxu0 %v845_v34  ;;  %v828_v17 = vld [vmem:[%s5472_s0 + $0x3f0] sm:$0xff]  ;;  %v827_v21 = vld [vmem:[%s5472_s0 + $0x3e8] sm:$0xff]  ;;  %v850_v22 = vld [vmem:[%s5472_s0 + $0x4a0] sm:$0xff] }
  0x2c   :  { %2777 = vmatprep.subr.mxu1 %v760_v27  ;;  %2874 = vmatprep.subr.mxu0 %v860_v36  ;;  %v812_v19 = vld [vmem:[%s5472_s0 + $0x370] sm:$0xff]  ;;  %v811_v23 = vld [vmem:[%s5472_s0 + $0x368] sm:$0xff]  ;;  %v834_v24 = vld [vmem:[%s5472_s0 + $0x420] sm:$0xff] }
  0x2d   :  { %2778 = vmatpush3.msra.mxu1 %v744_v28  ;;  %2875 = vmatpush3.msra.mxu0 %v844_v38  ;;  %v826_v25 = vld [vmem:[%s5472_s0 + $0x3e0] sm:$0xff]  ;;  %v849_v26 = vld [vmem:[%s5472_s0 + $0x498] sm:$0xff]  ;;  %v2697_v29 = vld [vmem:[%s5475_s3 + $0x12] sm:$0x3] }
  0x2e   :  { %2779 = vmatprep.subr.mxu1 %v759_v31  ;;  %2876 = vmatprep.subr.mxu0 %v859_v41  ;;  %v810_v27 = vld [vmem:[%s5472_s0 + $0x360] sm:$0xff]  ;;  %v833_v28 = vld [vmem:[%s5472_s0 + $0x418] sm:$0xff]  ;;  %v848_v31 = vld [vmem:[%s5472_s0 + $0x490] sm:$0xff] }
  0x2f   :  { %2780 = vmatpush3.msra.mxu1 %v743_v33  ;;  %2877 = vmatpush3.msra.mxu0 %v843_v43  ;;  %v825_v30 = vld [vmem:[%s5472_s0 + $0x3d8] sm:$0xff]  ;;  %v832_v33 = vld [vmem:[%s5472_s0 + $0x410] sm:$0xff]  ;;  %v847_v36 = vld [vmem:[%s5472_s0 + $0x488] sm:$0xff] }
  0x30   :  { %2781 = vmatprep.subr.mxu1 %v758_v35  ;;  %2878 = vmatprep.subr.mxu0 %v858_v45  ;;  %v809_v32 = vld [vmem:[%s5472_s0 + $0x358] sm:$0xff]  ;;  %v2696_v34 = vld [vmem:[%s5475_s3 + $0x10] sm:$0x3]  ;;  %v831_v39 = vld [vmem:[%s5472_s0 + $0x408] sm:$0xff] }
  0x31   :  { %2782 = vmatpush3.msra.mxu1 %v742_v37  ;;  %1447 = vmatprep.mubr.f32.mxu1 %v667_v46  ;;  %v824_v35 = vld [vmem:[%s5472_s0 + $0x3d0] sm:$0xff]  ;;  %v168_v37 = vsel %vm24_vm0, %v2697_v29, %v3399_v0  ;;  %v846_v41 = vld [vmem:[%s5472_s0 + $0x480] sm:$0xff]  ;;  %v807_v43 = vld [vmem:[%s5472_s0 + $0x348] sm:$0xff] }
  0x32   :  { %2783 = vmatprep.subr.mxu1 %v757_v40  ;;  %2879 = vmatpush3.msra.mxu0 %v842_v49  ;;  %v808_v38 = vld [vmem:[%s5472_s0 + $0x350] sm:$0xff]  ;;  %v823_v40 = vld [vmem:[%s5472_s0 + $0x3c8] sm:$0xff]  ;;  %v673_v45 = vmax.f32 %v168_v37, 0.0  ;;  %v822_v46 = vld [vmem:[%s5472_s0 + $0x3c0] sm:$0xff] }
  0x33   :  { %2784 = vmatpush3.msra.mxu1 %v741_v42  ;;  %2880 = vmatprep.subr.mxu0 %v857_v51  ;;  %v152_v42 = vsel %vm24_vm0, %v2696_v34, %v3399_v0  ;;  %v2695_v51 = vld [vmem:[%s5475_s3 + $0xe] sm:$0x3]  ;;  %v802_v3 = vld [vmem:[%s5472_s0 + $0x320] sm:$0xff]  ;;  %v917_v29 = vld [vmem:[%s5472_s0 + $0x6b8] sm:$0xff] }
  0x34   :  { %2785 = vmatprep.subr.mxu1 %v756_v44  ;;  %2881 = vmatpush3.msra.mxu0 %v841_v53  ;;  %v830_v44 = vld [vmem:[%s5472_s0 + $0x400] sm:$0xff]  ;;  %v672_v49 = vmax.f32 %v152_v42, 0.0  ;;  %v909_v53 = vld [vmem:[%s5472_s0 + $0x678] sm:$0xff]  ;;  %v819_v59 = vld [vmem:[%s5472_s0 + $0x3a8] sm:$0xff] }
  0x35   :  { %2786 = vmatpush3.msra.mxu1 %v740_v47  ;;  %2882 = vmatprep.subr.mxu0 %v856_v55  ;;  %v806_v47 = vld [vmem:[%s5472_s0 + $0x340] sm:$0xff]  ;;  %v924_v55 = vld [vmem:[%s5472_s0 + $0x6f0] sm:$0xff]  ;;  %v875_v34 = vld [vmem:[%s5472_s0 + $0x568] sm:$0xff] }
  0x36   :  { %2787 = vmatprep.subr.mxu1 %v755_v48  ;;  %2883 = vmatpush3.msra.mxu0 %v840_v57  ;;  %v925_v48 = vld [vmem:[%s5472_s0 + $0x6f8] sm:$0xff]  ;;  %v908_v57 = vld [vmem:[%s5472_s0 + $0x670] sm:$0xff]  ;;  %v915_v37 = vld [vmem:[%s5472_s0 + $0x6a8] sm:$0xff] }
  0x37   :  { %2788 = vmatpush3.msra.mxu1 %v739_v50  ;;  %2884 = vmatprep.subr.mxu0 %v855_v60  ;;  %v821_v50 = vld [vmem:[%s5472_s0 + $0x3b8] sm:$0xff]  ;;  %v923_v60 = vld [vmem:[%s5472_s0 + $0x6e8] sm:$0xff] }
  0x38   :  { %2789 = vmatprep.subr.mxu1 %v754_v52  ;;  %2885 = vmatpush3.msra.mxu0 %v839_v62  ;;  %v805_v52 = vld [vmem:[%s5472_s0 + $0x338] sm:$0xff]  ;;  %v907_v62 = vld [vmem:[%s5472_s0 + $0x668] sm:$0xff] }
  0x39   :  { %2790 = vmatpush3.msra.mxu1 %v738_v54  ;;  %2886 = vmatprep.subr.mxu0 %v854_v1  ;;  %v820_v54 = vld [vmem:[%s5472_s0 + $0x3b0] sm:$0xff]  ;;  %v922_v1 = vld [vmem:[%s5472_s0 + $0x6e0] sm:$0xff]  ;;  %v873_v42 = vld [vmem:[%s5472_s0 + $0x558] sm:$0xff] }
  0x3a   :  { %2791 = vmatprep.subr.mxu1 %v753_v56  ;;  %2887 = vmatpush3.msra.mxu0 %v838_v4  ;;  %v804_v56 = vld [vmem:[%s5472_s0 + $0x330] sm:$0xff]  ;;  %v817_v4 = vld [vmem:[%s5472_s0 + $0x398] sm:$0xff] }
  0x3b   :  { %2792 = vmatpush3.msra.mxu1 %v737_v58  ;;  %2888 = vmatprep.subr.mxu0 %v853_v6  ;;  %v136_v58 = vsel %vm24_vm0, %v2695_v51, %v3399_v0  ;;  %v801_v6 = vld [vmem:[%s5472_s0 + $0x318] sm:$0xff]  ;;  %v871_v51 = vld [vmem:[%s5472_s0 + $0x548] sm:$0xff] }
  0x3c   :  { %2793 = vmatprep.subr.mxu1 %v752_v61  ;;  %2889 = vmatpush3.msra.mxu0 %v837_v9  ;;  %v803_v61 = vld [vmem:[%s5472_s0 + $0x328] sm:$0xff]  ;;  %v921_v9 = vld [vmem:[%s5472_s0 + $0x6d8] sm:$0xff] }
  0x3d   :  { %2794 = vmatpush3.msra.mxu1 %v736_v63  ;;  %2890 = vmatprep.subr.mxu0 %v852_v13  ;;  %v818_v63 = vld [vmem:[%s5472_s0 + $0x3a0] sm:$0xff]  ;;  %v800_v13 = vld [vmem:[%s5472_s0 + $0x310] sm:$0xff] }
  0x3e   :  { %2795 = vmatprep.subr.mxu1 %v751_v2  ;;  %2891 = vmatpush3.msra.mxu0 %v836_v16  ;;  %v671_v2 = vmax.f32 %v136_v58, 0.0  ;;  %v895_v58 = vld [vmem:[%s5472_s0 + $0x608] sm:$0xff] }
  0x3f   :  { %2796 = vmatpush3.msra.mxu1 %v735_v5  ;;  %2892 = vmatprep.subr.mxu0 %v851_v18  ;;  %v906_v5 = vld [vmem:[%s5472_s0 + $0x660] sm:$0xff]  ;;  %v799_v18 = vld [vmem:[%s5472_s0 + $0x308] sm:$0xff] }
  0x40   :  { %2797 = vmatprep.subr.mxu1 %v750_v8  ;;  %2893 = vmatpush3.msra.mxu0 %v835_v20  ;;  %v2694_v8 = vld [vmem:[%s5475_s3 + $0xc] sm:$0x3]  ;;  %v814_v20 = vld [vmem:[%s5472_s0 + $0x380] sm:$0xff] }
  0x41   :  { %2798 = vmatpush3.msra.mxu1 %v734_v10  ;;  %2894 = vmatprep.subr.mxu0 %v850_v22  ;;  %v816_v10 = vld [vmem:[%s5472_s0 + $0x390] sm:$0xff]  ;;  %v120_v16 = vsel %vm24_vm0, %v2694_v8, %v3399_v0  ;;  %v798_v22 = vld [vmem:[%s5472_s0 + $0x300] sm:$0xff] }
  0x42   :  { %1448 = vmatmul.mubr.f32.vlgmr.msra.gmra.mxu1 %v666_v11  ;;  %2837 = vmatprep.subr.mxu1 %v829_v14  ;;  %v905_v11 = vld [vmem:[%s5472_s0 + $0x658] sm:$0xff]  ;;  %v920_v14 = vld [vmem:[%s5472_s0 + $0x6d0] sm:$0xff] }
  0x43   :  { %2838 = vmatpush3.msra.mxu1 %v813_v15  ;;  %2895 = vmatpush3.msra.mxu0 %v834_v24  ;;  %v815_v15 = vld [vmem:[%s5472_s0 + $0x388] sm:$0xff]  ;;  %v918_v24 = vld [vmem:[%s5472_s0 + $0x6c0] sm:$0xff]  ;;  %v2699_v8 = vld [vmem:[%s5475_s3 + $0x16] sm:$0x3] }
  0x44   :  { %2839 = vmatprep.subr.mxu1 %v828_v17  ;;  %2896 = vmatprep.subr.mxu0 %v849_v26  ;;  %v904_v17 = vld [vmem:[%s5472_s0 + $0x650] sm:$0xff]  ;;  %v877_v26 = vld [vmem:[%s5472_s0 + $0x578] sm:$0xff] }
  0x45   :  { %2840 = vmatpush3.msra.mxu1 %v812_v19  ;;  %2897 = vmatpush3.msra.mxu0 %v833_v28  ;;  %v919_v19 = vld [vmem:[%s5472_s0 + $0x6c8] sm:$0xff]  ;;  %v892_v28 = vld [vmem:[%s5472_s0 + $0x5f0] sm:$0xff] }
  0x46   :  { %2841 = vmatprep.subr.mxu1 %v827_v21  ;;  %2898 = vmatprep.subr.mxu0 %v848_v31  ;;  %v903_v21 = vld [vmem:[%s5472_s0 + $0x648] sm:$0xff]  ;;  %v901_v31 = vld [vmem:[%s5472_s0 + $0x638] sm:$0xff] }
  0x47   :  { %2842 = vmatpush3.msra.mxu1 %v811_v23  ;;  %2899 = vmatpush3.msra.mxu0 %v832_v33  ;;  %v670_v23 = vmax.f32 %v120_v16, 0.0  ;;  %v916_v33 = vld [vmem:[%s5472_s0 + $0x6b0] sm:$0xff]  ;;  %v200_v16 = vsel %vm24_vm0, %v2699_v8, %v3399_v0  ;;  %v933_v8 = vld [vmem:[%s5472_s0 + $0x738] sm:$0xff] }
  0x48   :  { %2843 = vmatprep.subr.mxu1 %v826_v25  ;;  %2900 = vmatprep.subr.mxu0 %v847_v36  ;;  %v893_v25 = vld [vmem:[%s5472_s0 + $0x5f8] sm:$0xff]  ;;  %v890_v36 = vld [vmem:[%s5472_s0 + $0x5e0] sm:$0xff] }
  0x49   :  { %2844 = vmatpush3.msra.mxu1 %v810_v27  ;;  %2901 = vmatpush3.msra.mxu0 %v831_v39  ;;  %v902_v27 = vld [vmem:[%s5472_s0 + $0x640] sm:$0xff]  ;;  %v899_v39 = vld [vmem:[%s5472_s0 + $0x628] sm:$0xff] }
  0x4a   :  { %2845 = vmatprep.subr.mxu1 %v825_v30  ;;  %2902 = vmatprep.subr.mxu0 %v846_v41  ;;  %v876_v30 = vld [vmem:[%s5472_s0 + $0x570] sm:$0xff]  ;;  %v914_v41 = vld [vmem:[%s5472_s0 + $0x6a0] sm:$0xff] }
  0x4b   :  { %2846 = vmatpush3.msra.mxu1 %v809_v32  ;;  %2903 = vmatpush3.msra.mxu0 %v830_v44  ;;  %v891_v32 = vld [vmem:[%s5472_s0 + $0x5e8] sm:$0xff]  ;;  %v888_v44 = vld [vmem:[%s5472_s0 + $0x5d0] sm:$0xff] }
  0x4c   :  { %2847 = vmatprep.subr.mxu1 %v824_v35  ;;  %1657 = vmatprep.mubr.f32.mxu0 %v673_v45  ;;  %v900_v35 = vld [vmem:[%s5472_s0 + $0x630] sm:$0xff]  ;;  %v913_v45 = vld [vmem:[%s5472_s0 + $0x698] sm:$0xff] }
  0x4d   :  { %2848 = vmatpush3.msra.mxu1 %v808_v38  ;;  %2942 = vmatprep.subr.mxu0 %v925_v48  ;;  %v874_v38 = vld [vmem:[%s5472_s0 + $0x560] sm:$0xff]  ;;  %v2701_v48 = vld [vmem:[%s5475_s3 + $0x1a] sm:$0x3] }
  0x4e   :  { %2849 = vmatprep.subr.mxu1 %v823_v40  ;;  %1658 = vmatmul.mubr.f32.vlgmr.msra.gmra.mxu0 %v672_v49  ;;  %v889_v40 = vld [vmem:[%s5472_s0 + $0x5d8] sm:$0xff]  ;;  %v887_v49 = vld [vmem:[%s5472_s0 + $0x5c8] sm:$0xff] }
  0x4f   :  { %2850 = vmatpush3.msra.mxu1 %v807_v43  ;;  %2943 = vmatpush3.msra.mxu0 %v909_v53  ;;  %v898_v43 = vld [vmem:[%s5472_s0 + $0x620] sm:$0xff]  ;;  %v2700_v53 = vld [vmem:[%s5475_s3 + $0x18] sm:$0x3] }
  0x50   :  { %2851 = vmatprep.subr.mxu1 %v822_v46  ;;  %2944 = vmatprep.subr.mxu0 %v924_v55  ;;  %v872_v46 = vld [vmem:[%s5472_s0 + $0x550] sm:$0xff]  ;;  %v911_v55 = vld [vmem:[%s5472_s0 + $0x688] sm:$0xff] }
  0x51   :  { %2852 = vmatpush3.msra.mxu1 %v806_v47  ;;  %2945 = vmatpush3.msra.mxu0 %v908_v57  ;;  %v897_v47 = vld [vmem:[%s5472_s0 + $0x618] sm:$0xff]  ;;  %v870_v57 = vld [vmem:[%s5472_s0 + $0x540] sm:$0xff] }
  0x52   :  { %2853 = vmatprep.subr.mxu1 %v821_v50  ;;  %2946 = vmatprep.subr.mxu0 %v923_v60  ;;  %v912_v50 = vld [vmem:[%s5472_s0 + $0x690] sm:$0xff]  ;;  %v910_v60 = vld [vmem:[%s5472_s0 + $0x680] sm:$0xff] }
  0x53   :  { %2854 = vmatpush3.msra.mxu1 %v805_v52  ;;  %2947 = vmatpush3.msra.mxu0 %v907_v62  ;;  %v896_v52 = vld [vmem:[%s5472_s0 + $0x610] sm:$0xff]  ;;  %v869_v62 = vld [vmem:[%s5472_s0 + $0x538] sm:$0xff] }
  0x54   :  { %2855 = vmatprep.subr.mxu1 %v820_v54  ;;  %2948 = vmatprep.subr.mxu0 %v922_v1  ;;  %v886_v54 = vld [vmem:[%s5472_s0 + $0x5c0] sm:$0xff] }
  0x55   :  { %2856 = vmatpush3.msra.mxu1 %v804_v56  ;;  %1587 = vmatprep.mubr.f32.mxu1 %v671_v2  ;;  %v232_v56 = vsel %vm24_vm0, %v2701_v48, %v3399_v0  ;;  %v884_v2 = vld [vmem:[%s5472_s0 + $0x5b0] sm:$0xff]  ;;  %v981_v48 = vld [vmem:[%s5472_s0 + $0x8b8] sm:$0xff] }
  0x56   :  { %2857 = vmatprep.subr.mxu1 %v819_v59  ;;  %2949 = vmatpush3.msra.mxu0 %v906_v5  ;;  %v885_v59 = vld [vmem:[%s5472_s0 + $0x5b8] sm:$0xff]  ;;  %v677_v1 = vmax.f32 %v232_v56, 0.0  ;;  %v979_v56 = vld [vmem:[%s5472_s0 + $0x8a8] sm:$0xff] }
  0x57   :  { %2858 = vmatpush3.msra.mxu1 %v803_v61  ;;  %2950 = vmatprep.subr.mxu0 %v921_v9  ;;  %v216_v61 = vsel %vm24_vm0, %v2700_v53, %v3399_v0  ;;  %v867_v9 = vld [vmem:[%s5472_s0 + $0x528] sm:$0xff]  ;;  %v937_v53 = vld [vmem:[%s5472_s0 + $0x758] sm:$0xff] }
  0x58   :  { %2859 = vmatprep.subr.mxu1 %v818_v63  ;;  %2951 = vmatpush3.msra.mxu0 %v905_v11  ;;  %v894_v63 = vld [vmem:[%s5472_s0 + $0x600] sm:$0xff]  ;;  %v676_v5 = vmax.f32 %v216_v61, 0.0  ;;  %v935_v61 = vld [vmem:[%s5472_s0 + $0x748] sm:$0xff] }
  0x59   :  { %2860 = vmatpush3.msra.mxu1 %v802_v3  ;;  %2952 = vmatprep.subr.mxu0 %v920_v14  ;;  %v868_v3 = vld [vmem:[%s5472_s0 + $0x530] sm:$0xff]  ;;  %v882_v11 = vld [vmem:[%s5472_s0 + $0x5a0] sm:$0xff] }
  0x5a   :  { %2861 = vmatprep.subr.mxu1 %v817_v4  ;;  %2953 = vmatpush3.msra.mxu0 %v904_v17  ;;  %v989_v4 = vld [vmem:[%s5472_s0 + $0x8f8] sm:$0xff]  ;;  %v866_v14 = vld [vmem:[%s5472_s0 + $0x520] sm:$0xff] }
  0x5b   :  { %2862 = vmatpush3.msra.mxu1 %v801_v6  ;;  %2954 = vmatprep.subr.mxu0 %v919_v19  ;;  %v883_v6 = vld [vmem:[%s5472_s0 + $0x5a8] sm:$0xff]  ;;  %v881_v17 = vld [vmem:[%s5472_s0 + $0x598] sm:$0xff] }
  0x5c   :  { %2863 = vmatprep.subr.mxu1 %v816_v10  ;;  %2955 = vmatpush3.msra.mxu0 %v903_v21  ;;  %v973_v10 = vld [vmem:[%s5472_s0 + $0x878] sm:$0xff]  ;;  %v2698_v21 = vld [vmem:[%s5475_s3 + $0x14] sm:$0x3] }
  0x5d   :  { %2864 = vmatpush3.msra.mxu1 %v800_v13  ;;  %2956 = vmatprep.subr.mxu0 %v918_v24  ;;  %v988_v13 = vld [vmem:[%s5472_s0 + $0x8f0] sm:$0xff]  ;;  %v865_v19 = vld [vmem:[%s5472_s0 + $0x518] sm:$0xff]  ;;  %v675_v24 = vmax.f32 %v200_v16, 0.0  ;;  %v959_v16 = vld [vmem:[%s5472_s0 + $0x808] sm:$0xff] }
  0x5e   :  { %2865 = vmatprep.subr.mxu1 %v815_v15  ;;  %2957 = vmatpush3.msra.mxu0 %v902_v27  ;;  %v972_v15 = vld [vmem:[%s5472_s0 + $0x870] sm:$0xff]  ;;  %v970_v27 = vld [vmem:[%s5472_s0 + $0x860] sm:$0xff] }
  0x5f   :  { %2866 = vmatpush3.msra.mxu1 %v799_v18  ;;  %2958 = vmatprep.subr.mxu0 %v917_v29  ;;  %v987_v18 = vld [vmem:[%s5472_s0 + $0x8e8] sm:$0xff] }
  0x60   :  { %2867 = vmatprep.subr.mxu1 %v814_v20  ;;  %2959 = vmatpush3.msra.mxu0 %v901_v31  ;;  %v971_v20 = vld [vmem:[%s5472_s0 + $0x868] sm:$0xff]  ;;  %v878_v31 = vld [vmem:[%s5472_s0 + $0x580] sm:$0xff] }
  0x61   :  { %2868 = vmatpush3.msra.mxu1 %v798_v22  ;;  %2960 = vmatprep.subr.mxu0 %v916_v33  ;;  %v880_v22 = vld [vmem:[%s5472_s0 + $0x590] sm:$0xff]  ;;  %v863_v29 = vld [vmem:[%s5472_s0 + $0x508] sm:$0xff]  ;;  %v862_v33 = vld [vmem:[%s5472_s0 + $0x500] sm:$0xff] }
  0x62   :  { %1588 = vmatmul.mubr.f32.vlgmr.msra.gmra.mxu1 %v670_v23  ;;  %2907 = vmatprep.subr.mxu1 %v893_v25  ;;  %v986_v23 = vld [vmem:[%s5472_s0 + $0x8e0] sm:$0xff]  ;;  %v864_v25 = vld [vmem:[%s5472_s0 + $0x510] sm:$0xff] }
  0x63   :  { %2908 = vmatpush3.msra.mxu1 %v877_v26  ;;  %2961 = vmatpush3.msra.mxu0 %v900_v35  ;;  %v879_v26 = vld [vmem:[%s5472_s0 + $0x588] sm:$0xff]  ;;  %v984_v35 = vld [vmem:[%s5472_s0 + $0x8d0] sm:$0xff] }
  0x64   :  { %2909 = vmatprep.subr.mxu1 %v892_v28  ;;  %2962 = vmatprep.subr.mxu0 %v915_v37  ;;  %v184_v28 = vsel %vm24_vm0, %v2698_v21, %v3399_v0  ;;  %v941_v37 = vld [vmem:[%s5472_s0 + $0x778] sm:$0xff]  ;;  %v958_v21 = vld [vmem:[%s5472_s0 + $0x800] sm:$0xff] }
  0x65   :  { %2910 = vmatpush3.msra.mxu1 %v876_v30  ;;  %2963 = vmatpush3.msra.mxu0 %v899_v39  ;;  %v985_v30 = vld [vmem:[%s5472_s0 + $0x8d8] sm:$0xff]  ;;  %v956_v39 = vld [vmem:[%s5472_s0 + $0x7f0] sm:$0xff] }
  0x66   :  { %2911 = vmatprep.subr.mxu1 %v891_v32  ;;  %2964 = vmatprep.subr.mxu0 %v914_v41  ;;  %v969_v32 = vld [vmem:[%s5472_s0 + $0x858] sm:$0xff]  ;;  %v940_v41 = vld [vmem:[%s5472_s0 + $0x770] sm:$0xff] }
  0x67   :  { %2912 = vmatpush3.msra.mxu1 %v875_v34  ;;  %2965 = vmatpush3.msra.mxu0 %v898_v43  ;;  %v674_v34 = vmax.f32 %v184_v28, 0.0  ;;  %v955_v43 = vld [vmem:[%s5472_s0 + $0x7e8] sm:$0xff]  ;;  %v2703_v28 = vld [vmem:[%s5475_s3 + $0x1e] sm:$0x3] }
  0x68   :  { %2913 = vmatprep.subr.mxu1 %v890_v36  ;;  %2966 = vmatprep.subr.mxu0 %v913_v45  ;;  %v957_v36 = vld [vmem:[%s5472_s0 + $0x7f8] sm:$0xff]  ;;  %v939_v45 = vld [vmem:[%s5472_s0 + $0x768] sm:$0xff] }
  0x69   :  { %2914 = vmatpush3.msra.mxu1 %v874_v38  ;;  %2967 = vmatpush3.msra.mxu0 %v897_v47  ;;  %v968_v38 = vld [vmem:[%s5472_s0 + $0x850] sm:$0xff]  ;;  %v954_v47 = vld [vmem:[%s5472_s0 + $0x7e0] sm:$0xff] }
  0x6a   :  { %2915 = vmatprep.subr.mxu1 %v889_v40  ;;  %2968 = vmatprep.subr.mxu0 %v912_v50  ;;  %v983_v40 = vld [vmem:[%s5472_s0 + $0x8c8] sm:$0xff]  ;;  %v965_v50 = vld [vmem:[%s5472_s0 + $0x838] sm:$0xff] }
  0x6b   :  { %2916 = vmatpush3.msra.mxu1 %v873_v42  ;;  %2969 = vmatpush3.msra.mxu0 %v896_v52  ;;  %v967_v42 = vld [vmem:[%s5472_s0 + $0x848] sm:$0xff]  ;;  %v980_v52 = vld [vmem:[%s5472_s0 + $0x8b0] sm:$0xff] }
  0x6c   :  { %2917 = vmatprep.subr.mxu1 %v888_v44  ;;  %2970 = vmatprep.subr.mxu0 %v911_v55  ;;  %v982_v44 = vld [vmem:[%s5472_s0 + $0x8c0] sm:$0xff]  ;;  %v952_v55 = vld [vmem:[%s5472_s0 + $0x7d0] sm:$0xff] }
  0x6d   :  { %2918 = vmatpush3.msra.mxu1 %v872_v46  ;;  %2971 = vmatpush3.msra.mxu0 %v895_v58  ;;  %v966_v46 = vld [vmem:[%s5472_s0 + $0x840] sm:$0xff]  ;;  %v963_v58 = vld [vmem:[%s5472_s0 + $0x828] sm:$0xff] }
  0x6e   :  { %2919 = vmatprep.subr.mxu1 %v887_v49  ;;  %2972 = vmatprep.subr.mxu0 %v910_v60  ;;  %v938_v49 = vld [vmem:[%s5472_s0 + $0x760] sm:$0xff] }
  0x6f   :  { %2920 = vmatpush3.msra.mxu1 %v871_v51  ;;  %2973 = vmatpush3.msra.mxu0 %v894_v63  ;;  %v953_v51 = vld [vmem:[%s5472_s0 + $0x7d8] sm:$0xff]  ;;  %v978_v60 = vld [vmem:[%s5472_s0 + $0x8a0] sm:$0xff] }
  0x70   :  { %2921 = vmatprep.subr.mxu1 %v886_v54  ;;  %1797 = vmatprep.mubr.f32.mxu0 %v677_v1  ;;  %v964_v54 = vld [vmem:[%s5472_s0 + $0x830] sm:$0xff]  ;;  %v950_v63 = vld [vmem:[%s5472_s0 + $0x7c0] sm:$0xff]  ;;  %v977_v1 = vld [vmem:[%s5472_s0 + $0x898] sm:$0xff] }
  0x71   :  { %2922 = vmatpush3.msra.mxu1 %v870_v57  ;;  %3012 = vmatprep.subr.mxu0 %v989_v4  ;;  %v936_v57 = vld [vmem:[%s5472_s0 + $0x750] sm:$0xff]  ;;  %v2705_v4 = vld [vmem:[%s5475_s3 + $0x22] sm:$0x3] }
  0x72   :  { %2923 = vmatprep.subr.mxu1 %v885_v59  ;;  %1798 = vmatmul.mubr.f32.vlgmr.msra.gmra.mxu0 %v676_v5  ;;  %v951_v59 = vld [vmem:[%s5472_s0 + $0x7c8] sm:$0xff]  ;;  %v949_v5 = vld [vmem:[%s5472_s0 + $0x7b8] sm:$0xff] }
  0x73   :  { %2924 = vmatpush3.msra.mxu1 %v869_v62  ;;  %3013 = vmatpush3.msra.mxu0 %v973_v10  ;;  %v962_v62 = vld [vmem:[%s5472_s0 + $0x820] sm:$0xff] }
  0x74   :  { %2925 = vmatprep.subr.mxu1 %v884_v2  ;;  %3014 = vmatprep.subr.mxu0 %v988_v13  ;;  %v934_v2 = vld [vmem:[%s5472_s0 + $0x740] sm:$0xff]  ;;  %v975_v13 = vld [vmem:[%s5472_s0 + $0x888] sm:$0xff] }
  0x75   :  { %2926 = vmatpush3.msra.mxu1 %v868_v3  ;;  %3015 = vmatpush3.msra.mxu0 %v972_v15  ;;  %v961_v3 = vld [vmem:[%s5472_s0 + $0x818] sm:$0xff]  ;;  %v2704_v10 = vld [vmem:[%s5475_s3 + $0x20] sm:$0x3]  ;;  %v932_v15 = vld [vmem:[%s5472_s0 + $0x730] sm:$0xff] }
  0x76   :  { %2927 = vmatprep.subr.mxu1 %v883_v6  ;;  %3016 = vmatprep.subr.mxu0 %v987_v18  ;;  %v976_v6 = vld [vmem:[%s5472_s0 + $0x890] sm:$0xff]  ;;  %v974_v18 = vld [vmem:[%s5472_s0 + $0x880] sm:$0xff] }
  0x77   :  { %2928 = vmatpush3.msra.mxu1 %v867_v9  ;;  %3017 = vmatpush3.msra.mxu0 %v971_v20  ;;  %v960_v9 = vld [vmem:[%s5472_s0 + $0x810] sm:$0xff]  ;;  %v931_v20 = vld [vmem:[%s5472_s0 + $0x728] sm:$0xff] }
  0x78   :  { %2929 = vmatprep.subr.mxu1 %v882_v11  ;;  %3018 = vmatprep.subr.mxu0 %v986_v23  ;;  %v948_v11 = vld [vmem:[%s5472_s0 + $0x7b0] sm:$0xff]  ;;  %v946_v23 = vld [vmem:[%s5472_s0 + $0x7a0] sm:$0xff] }
  0x79   :  { %2930 = vmatpush3.msra.mxu1 %v866_v14  ;;  %1727 = vmatprep.mubr.f32.mxu1 %v675_v24  ;;  %v296_v14 = vsel %vm24_vm0, %v2705_v4, %v3399_v0  ;;  %v930_v24 = vld [vmem:[%s5472_s0 + $0x720] sm:$0xff]  ;;  %v1029_v4 = vld [vmem:[%s5472_s0 + $0xa38] sm:$0xff] }
  0x7a   :  { %2931 = vmatprep.subr.mxu1 %v881_v17  ;;  %3019 = vmatpush3.msra.mxu0 %v970_v27  ;;  %v947_v17 = vld [vmem:[%s5472_s0 + $0x7a8] sm:$0xff]  ;;  %v945_v27 = vld [vmem:[%s5472_s0 + $0x798] sm:$0xff] }
  0x7b   :  { %2932 = vmatpush3.msra.mxu1 %v865_v19  ;;  %3020 = vmatprep.subr.mxu0 %v985_v30  ;;  %v280_v19 = vsel %vm24_vm0, %v2704_v10, %v3399_v0  ;;  %v1037_v30 = vld [vmem:[%s5472_s0 + $0xa78] sm:$0xff]  ;;  %v1015_v10 = vld [vmem:[%s5472_s0 + $0x9c8] sm:$0xff] }
  0x7c   :  { %2933 = vmatprep.subr.mxu1 %v880_v22  ;;  %3021 = vmatpush3.msra.mxu0 %v969_v32  ;;  %v681_v22 = vmax.f32 %v296_v14, 0.0  ;;  %v944_v32 = vld [vmem:[%s5472_s0 + $0x790] sm:$0xff]  ;;  %v1027_v14 = vld [vmem:[%s5472_s0 + $0xa28] sm:$0xff] }
  0x7d   :  { %2934 = vmatpush3.msra.mxu1 %v864_v25  ;;  %3022 = vmatprep.subr.mxu0 %v984_v35  ;;  %v1053_v25 = vld [vmem:[%s5472_s0 + $0xaf8] sm:$0xff]  ;;  %v1036_v35 = vld [vmem:[%s5472_s0 + $0xa70] sm:$0xff] }
  0x7e   :  { %2935 = vmatprep.subr.mxu1 %v879_v26  ;;  %3023 = vmatpush3.msra.mxu0 %v968_v38  ;;  %v680_v26 = vmax.f32 %v280_v19, 0.0  ;;  %v1051_v38 = vld [vmem:[%s5472_s0 + $0xae8] sm:$0xff]  ;;  %v1013_v19 = vld [vmem:[%s5472_s0 + $0x9b8] sm:$0xff] }
  0x7f   :  { %2936 = vmatpush3.msra.mxu1 %v863_v29  ;;  %3024 = vmatprep.subr.mxu0 %v983_v40  ;;  %v929_v29 = vld [vmem:[%s5472_s0 + $0x718] sm:$0xff]  ;;  %v927_v40 = vld [vmem:[%s5472_s0 + $0x708] sm:$0xff] }
  0x80   :  { %2937 = vmatprep.subr.mxu1 %v878_v31  ;;  %3025 = vmatpush3.msra.mxu0 %v967_v42  ;;  %v2702_v31 = vld [vmem:[%s5475_s3 + $0x1c] sm:$0x3]  ;;  %v942_v42 = vld [vmem:[%s5472_s0 + $0x780] sm:$0xff] }
  0x81   :  { %2938 = vmatpush3.msra.mxu1 %v862_v33  ;;  %3026 = vmatprep.subr.mxu0 %v982_v44  ;;  %v1052_v33 = vld [vmem:[%s5472_s0 + $0xaf0] sm:$0xff] }
  0x82   :  { %1728 = vmatmul.mubr.f32.vlgmr.msra.gmra.mxu1 %v674_v34  ;;  %2977 = vmatprep.subr.mxu1 %v957_v36  ;;  %v928_v34 = vld [vmem:[%s5472_s0 + $0x710] sm:$0xff]  ;;  %v264_v36 = vsel %vm24_vm0, %v2703_v28, %v3399_v0  ;;  %v2708_v28 = vld [vmem:[%s5475_s3 + $0x28] sm:$0x3] }
  0x83   :  { %2978 = vmatpush3.msra.mxu1 %v941_v37  ;;  %3027 = vmatpush3.msra.mxu0 %v966_v46  ;;  %v943_v37 = vld [vmem:[%s5472_s0 + $0x788] sm:$0xff]  ;;  %v679_v44 = vmax.f32 %v264_v36, 0.0  ;;  %v344_v36 = vsel %vm24_vm0, %v2708_v28, %v3399_v0 }
  0x84   :  { %2979 = vmatprep.subr.mxu1 %v956_v39  ;;  %3028 = vmatprep.subr.mxu0 %v981_v48  ;;  %v248_v39 = vsel %vm24_vm0, %v2702_v31, %v3399_v0  ;;  %v1021_v48 = vld [vmem:[%s5472_s0 + $0x9f8] sm:$0xff]  ;;  %v1063_v28 = vld [vmem:[%s5472_s0 + $0xb48] sm:$0xff] }
  0x85   :  { %2980 = vmatpush3.msra.mxu1 %v940_v41  ;;  %3029 = vmatpush3.msra.mxu0 %v965_v50  ;;  %v1035_v41 = vld [vmem:[%s5472_s0 + $0xa68] sm:$0xff]  ;;  %v678_v46 = vmax.f32 %v248_v39, 0.0  ;;  %v1005_v50 = vld [vmem:[%s5472_s0 + $0x978] sm:$0xff] }
  0x86   :  { %2981 = vmatprep.subr.mxu1 %v955_v43  ;;  %3030 = vmatprep.subr.mxu0 %v980_v52  ;;  %v1050_v43 = vld [vmem:[%s5472_s0 + $0xae0] sm:$0xff]  ;;  %v1020_v52 = vld [vmem:[%s5472_s0 + $0x9f0] sm:$0xff] }
  0x87   :  { %2982 = vmatpush3.msra.mxu1 %v939_v45  ;;  %3031 = vmatpush3.msra.mxu0 %v964_v54  ;;  %v926_v45 = vld [vmem:[%s5472_s0 + $0x700] sm:$0xff]  ;;  %v1004_v54 = vld [vmem:[%s5472_s0 + $0x970] sm:$0xff] }
  0x88   :  { %2983 = vmatprep.subr.mxu1 %v954_v47  ;;  %3032 = vmatprep.subr.mxu0 %v979_v56  ;;  %v1034_v47 = vld [vmem:[%s5472_s0 + $0xa60] sm:$0xff]  ;;  %v1019_v56 = vld [vmem:[%s5472_s0 + $0x9e8] sm:$0xff] }
  0x89   :  { %2984 = vmatpush3.msra.mxu1 %v938_v49  ;;  %3033 = vmatpush3.msra.mxu0 %v963_v58  ;;  %v1049_v49 = vld [vmem:[%s5472_s0 + $0xad8] sm:$0xff]  ;;  %v1003_v58 = vld [vmem:[%s5472_s0 + $0x968] sm:$0xff] }
  0x8a   :  { %2985 = vmatprep.subr.mxu1 %v953_v51  ;;  %3034 = vmatprep.subr.mxu0 %v978_v60  ;;  %v1033_v51 = vld [vmem:[%s5472_s0 + $0xa58] sm:$0xff]  ;;  %v1018_v60 = vld [vmem:[%s5472_s0 + $0x9e0] sm:$0xff] }
  0x8b   :  { %2986 = vmatpush3.msra.mxu1 %v937_v53  ;;  %3035 = vmatpush3.msra.mxu0 %v962_v62  ;;  %v1048_v53 = vld [vmem:[%s5472_s0 + $0xad0] sm:$0xff]  ;;  %v1002_v62 = vld [vmem:[%s5472_s0 + $0x960] sm:$0xff] }
  0x8c   :  { %2987 = vmatprep.subr.mxu1 %v952_v55  ;;  %3036 = vmatprep.subr.mxu0 %v977_v1  ;;  %v1032_v55 = vld [vmem:[%s5472_s0 + $0xa50] sm:$0xff]  ;;  %v1017_v1 = vld [vmem:[%s5472_s0 + $0x9d8] sm:$0xff] }
  0x8d   :  { %2988 = vmatpush3.msra.mxu1 %v936_v57  ;;  %3037 = vmatpush3.msra.mxu0 %v961_v3  ;;  %v1047_v57 = vld [vmem:[%s5472_s0 + $0xac8] sm:$0xff]  ;;  %v1001_v3 = vld [vmem:[%s5472_s0 + $0x958] sm:$0xff] }
  0x8e   :  { %2989 = vmatprep.subr.mxu1 %v951_v59  ;;  %3038 = vmatprep.subr.mxu0 %v976_v6  ;;  %v1031_v59 = vld [vmem:[%s5472_s0 + $0xa48] sm:$0xff]  ;;  %v1044_v6 = vld [vmem:[%s5472_s0 + $0xab0] sm:$0xff] }
  0x8f   :  { %2990 = vmatpush3.msra.mxu1 %v935_v61  ;;  %3039 = vmatpush3.msra.mxu0 %v960_v9  ;;  %v1046_v61 = vld [vmem:[%s5472_s0 + $0xac0] sm:$0xff]  ;;  %v1028_v9 = vld [vmem:[%s5472_s0 + $0xa30] sm:$0xff] }
  0x90   :  { %2991 = vmatprep.subr.mxu1 %v950_v63  ;;  %3040 = vmatprep.subr.mxu0 %v975_v13  ;;  %v1030_v63 = vld [vmem:[%s5472_s0 + $0xa40] sm:$0xff]  ;;  %v999_v13 = vld [vmem:[%s5472_s0 + $0x948] sm:$0xff] }
  0x91   :  { %2992 = vmatpush3.msra.mxu1 %v934_v2  ;;  %3041 = vmatpush3.msra.mxu0 %v959_v16  ;;  %v1045_v2 = vld [vmem:[%s5472_s0 + $0xab8] sm:$0xff]  ;;  %v1042_v16 = vld [vmem:[%s5472_s0 + $0xaa0] sm:$0xff] }
  0x92   :  { %2993 = vmatprep.subr.mxu1 %v949_v5  ;;  %3042 = vmatprep.subr.mxu0 %v974_v18  ;;  %v1016_v5 = vld [vmem:[%s5472_s0 + $0x9d0] sm:$0xff]  ;;  %v1026_v18 = vld [vmem:[%s5472_s0 + $0xa20] sm:$0xff] }
  0x93   :  { %2994 = vmatpush3.msra.mxu1 %v933_v8  ;;  %3043 = vmatpush3.msra.mxu0 %v958_v21  ;;  %v1000_v8 = vld [vmem:[%s5472_s0 + $0x950] sm:$0xff]  ;;  %v997_v21 = vld [vmem:[%s5472_s0 + $0x938] sm:$0xff] }
  0x94   :  { %2995 = vmatprep.subr.mxu1 %v948_v11  ;;  %1937 = vmatprep.mubr.f32.mxu0 %v681_v22  ;;  %v1043_v11 = vld [vmem:[%s5472_s0 + $0xaa8] sm:$0xff]  ;;  %v1025_v22 = vld [vmem:[%s5472_s0 + $0xa18] sm:$0xff] }
  0x95   :  { %2996 = vmatpush3.msra.mxu1 %v932_v15  ;;  %3082 = vmatprep.subr.mxu0 %v1053_v25  ;;  %v1014_v15 = vld [vmem:[%s5472_s0 + $0x9c0] sm:$0xff]  ;;  %v1040_v25 = vld [vmem:[%s5472_s0 + $0xa90] sm:$0xff] }
  0x96   :  { %2997 = vmatprep.subr.mxu1 %v947_v17  ;;  %1938 = vmatmul.mubr.f32.vlgmr.msra.gmra.mxu0 %v680_v26  ;;  %v998_v17 = vld [vmem:[%s5472_s0 + $0x940] sm:$0xff]  ;;  %v996_v26 = vld [vmem:[%s5472_s0 + $0x930] sm:$0xff] }
  0x97   :  { %2998 = vmatpush3.msra.mxu1 %v931_v20  ;;  %3083 = vmatpush3.msra.mxu0 %v1037_v30  ;;  %v1041_v20 = vld [vmem:[%s5472_s0 + $0xa98] sm:$0xff]  ;;  %v1039_v30 = vld [vmem:[%s5472_s0 + $0xa88] sm:$0xff] }
  0x98   :  { %2999 = vmatprep.subr.mxu1 %v946_v23  ;;  %3084 = vmatprep.subr.mxu0 %v1052_v33  ;;  %v2709_v23 = vld [vmem:[%s5475_s3 + $0x2a] sm:$0x3] }
  0x99   :  { %3000 = vmatpush3.msra.mxu1 %v930_v24  ;;  %3085 = vmatpush3.msra.mxu0 %v1036_v35  ;;  %v1012_v24 = vld [vmem:[%s5472_s0 + $0x9b0] sm:$0xff]  ;;  %v360_v31 = vsel %vm24_vm0, %v2709_v23, %v3399_v0  ;;  %v1023_v33 = vld [vmem:[%s5472_s0 + $0xa08] sm:$0xff]  ;;  %v1038_v35 = vld [vmem:[%s5472_s0 + $0xa80] sm:$0xff] }
  0x9a   :  { %3001 = vmatprep.subr.mxu1 %v945_v27  ;;  %3086 = vmatprep.subr.mxu0 %v1051_v38  ;;  %v1024_v27 = vld [vmem:[%s5472_s0 + $0xa10] sm:$0xff]  ;;  %v1022_v38 = vld [vmem:[%s5472_s0 + $0xa00] sm:$0xff]  ;;  %v685_v39 = vmax.f32 %v360_v31, 0.0 }
  0x9b   :  { %3002 = vmatpush3.msra.mxu1 %v929_v29  ;;  %3087 = vmatpush3.msra.mxu0 %v1035_v41  ;;  %v1011_v29 = vld [vmem:[%s5472_s0 + $0x9a8] sm:$0xff]  ;;  %v1117_v41 = vld [vmem:[%s5472_s0 + $0xcf8] sm:$0xff]  ;;  %v1108_v23 = vld [vmem:[%s5472_s0 + $0xcb0] sm:$0xff] }
  0x9c   :  { %3003 = vmatprep.subr.mxu1 %v944_v32  ;;  %3088 = vmatprep.subr.mxu0 %v1050_v43  ;;  %v995_v32 = vld [vmem:[%s5472_s0 + $0x928] sm:$0xff]  ;;  %v684_v43 = vmax.f32 %v344_v36, 0.0  ;;  %v1106_v31 = vld [vmem:[%s5472_s0 + $0xca0] sm:$0xff]  ;;  %v1061_v36 = vld [vmem:[%s5472_s0 + $0xb38] sm:$0xff] }
  0x9d   :  { %3004 = vmatpush3.msra.mxu1 %v928_v34  ;;  %1867 = vmatprep.mubr.f32.mxu1 %v679_v44  ;;  %v1010_v34 = vld [vmem:[%s5472_s0 + $0x9a0] sm:$0xff] }
  0x9e   :  { %3005 = vmatprep.subr.mxu1 %v943_v37  ;;  %3089 = vmatpush3.msra.mxu0 %v1034_v47  ;;  %v994_v37 = vld [vmem:[%s5472_s0 + $0x920] sm:$0xff]  ;;  %v1101_v47 = vld [vmem:[%s5472_s0 + $0xc78] sm:$0xff] }
  0x9f   :  { %3006 = vmatpush3.msra.mxu1 %v927_v40  ;;  %3090 = vmatprep.subr.mxu0 %v1049_v49  ;;  %v1009_v40 = vld [vmem:[%s5472_s0 + $0x998] sm:$0xff]  ;;  %v2707_v44 = vld [vmem:[%s5475_s3 + $0x26] sm:$0x3]  ;;  %v1116_v49 = vld [vmem:[%s5472_s0 + $0xcf0] sm:$0xff] }
  0xa0   :  { %3007 = vmatprep.subr.mxu1 %v942_v42  ;;  %3091 = vmatpush3.msra.mxu0 %v1033_v51  ;;  %v993_v42 = vld [vmem:[%s5472_s0 + $0x918] sm:$0xff]  ;;  %v328_v51 = vsel %vm24_vm0, %v2707_v44, %v3399_v0  ;;  %v1075_v44 = vld [vmem:[%s5472_s0 + $0xba8] sm:$0xff] }
  0xa1   :  { %3008 = vmatpush3.msra.mxu1 %v926_v45  ;;  %3092 = vmatprep.subr.mxu0 %v1048_v53  ;;  %v1008_v45 = vld [vmem:[%s5472_s0 + $0x990] sm:$0xff]  ;;  %v991_v53 = vld [vmem:[%s5472_s0 + $0x908] sm:$0xff] }
  0xa2   :  { %1868 = vmatmul.mubr.f32.vlgmr.msra.gmra.mxu1 %v678_v46  ;;  %3047 = vmatprep.subr.mxu1 %v1021_v48  ;;  %v2706_v46 = vld [vmem:[%s5475_s3 + $0x24] sm:$0x3]  ;;  %v992_v48 = vld [vmem:[%s5472_s0 + $0x910] sm:$0xff] }
  0xa3   :  { %3048 = vmatpush3.msra.mxu1 %v1005_v50  ;;  %3093 = vmatpush3.msra.mxu0 %v1032_v55  ;;  %v1007_v50 = vld [vmem:[%s5472_s0 + $0x988] sm:$0xff] }
  0xa4   :  { %3049 = vmatprep.subr.mxu1 %v1020_v52  ;;  %3094 = vmatprep.subr.mxu0 %v1047_v57  ;;  %v1100_v52 = vld [vmem:[%s5472_s0 + $0xc70] sm:$0xff]  ;;  %v1115_v55 = vld [vmem:[%s5472_s0 + $0xce8] sm:$0xff] }
  0xa5   :  { %3050 = vmatpush3.msra.mxu1 %v1004_v54  ;;  %3095 = vmatpush3.msra.mxu0 %v1031_v59  ;;  %v312_v54 = vsel %vm24_vm0, %v2706_v46, %v3399_v0  ;;  %v1099_v57 = vld [vmem:[%s5472_s0 + $0xc68] sm:$0xff]  ;;  %v683_v59 = vmax.f32 %v328_v51, 0.0 }
  0xa6   :  { %3051 = vmatprep.subr.mxu1 %v1019_v56  ;;  %3096 = vmatprep.subr.mxu0 %v1046_v61  ;;  %v1006_v56 = vld [vmem:[%s5472_s0 + $0x980] sm:$0xff]  ;;  %v682_v61 = vmax.f32 %v312_v54, 0.0 }
  0xa7   :  { %3052 = vmatpush3.msra.mxu1 %v1003_v58  ;;  %3097 = vmatpush3.msra.mxu0 %v1030_v63  ;;  %v990_v58 = vld [vmem:[%s5472_s0 + $0x900] sm:$0xff]  ;;  %v1085_v63 = vld [vmem:[%s5472_s0 + $0xbf8] sm:$0xff] }
  0xa8   :  { %3053 = vmatprep.subr.mxu1 %v1018_v60  ;;  %3098 = vmatprep.subr.mxu0 %v1045_v2  ;;  %v1114_v60 = vld [vmem:[%s5472_s0 + $0xce0] sm:$0xff]  ;;  %v1069_v2 = vld [vmem:[%s5472_s0 + $0xb78] sm:$0xff] }
  0xa9   :  { %3054 = vmatpush3.msra.mxu1 %v1002_v62  ;;  %3099 = vmatpush3.msra.mxu0 %v1029_v4  ;;  %v1098_v62 = vld [vmem:[%s5472_s0 + $0xc60] sm:$0xff]  ;;  %v1084_v4 = vld [vmem:[%s5472_s0 + $0xbf0] sm:$0xff] }
  0xaa   :  { %3055 = vmatprep.subr.mxu1 %v1017_v1  ;;  %3100 = vmatprep.subr.mxu0 %v1044_v6  ;;  %v1113_v1 = vld [vmem:[%s5472_s0 + $0xcd8] sm:$0xff]  ;;  %v1068_v6 = vld [vmem:[%s5472_s0 + $0xb70] sm:$0xff] }
  0xab   :  { %3056 = vmatpush3.msra.mxu1 %v1001_v3  ;;  %3101 = vmatpush3.msra.mxu0 %v1028_v9  ;;  %v1097_v3 = vld [vmem:[%s5472_s0 + $0xc58] sm:$0xff]  ;;  %v1083_v9 = vld [vmem:[%s5472_s0 + $0xbe8] sm:$0xff] }
  0xac   :  { %3057 = vmatprep.subr.mxu1 %v1016_v5  ;;  %3102 = vmatprep.subr.mxu0 %v1043_v11  ;;  %v1112_v5 = vld [vmem:[%s5472_s0 + $0xcd0] sm:$0xff]  ;;  %v1067_v11 = vld [vmem:[%s5472_s0 + $0xb68] sm:$0xff] }
  0xad   :  { %3058 = vmatpush3.msra.mxu1 %v1000_v8  ;;  %3103 = vmatpush3.msra.mxu0 %v1027_v14  ;;  %v1096_v8 = vld [vmem:[%s5472_s0 + $0xc50] sm:$0xff]  ;;  %v1082_v14 = vld [vmem:[%s5472_s0 + $0xbe0] sm:$0xff] }
  0xae   :  { %3059 = vmatprep.subr.mxu1 %v1015_v10  ;;  %3104 = vmatprep.subr.mxu0 %v1042_v16  ;;  %v1111_v10 = vld [vmem:[%s5472_s0 + $0xcc8] sm:$0xff]  ;;  %v1066_v16 = vld [vmem:[%s5472_s0 + $0xb60] sm:$0xff] }
  0xaf   :  { %3060 = vmatpush3.msra.mxu1 %v999_v13  ;;  %3105 = vmatpush3.msra.mxu0 %v1026_v18  ;;  %v1095_v13 = vld [vmem:[%s5472_s0 + $0xc48] sm:$0xff]  ;;  %v1081_v18 = vld [vmem:[%s5472_s0 + $0xbd8] sm:$0xff] }
  0xb0   :  { %3061 = vmatprep.subr.mxu1 %v1014_v15  ;;  %3106 = vmatprep.subr.mxu0 %v1041_v20  ;;  %v1110_v15 = vld [vmem:[%s5472_s0 + $0xcc0] sm:$0xff]  ;;  %v1065_v20 = vld [vmem:[%s5472_s0 + $0xb58] sm:$0xff] }
  0xb1   :  { %3062 = vmatpush3.msra.mxu1 %v998_v17  ;;  %3107 = vmatpush3.msra.mxu0 %v1025_v22  ;;  %v1094_v17 = vld [vmem:[%s5472_s0 + $0xc40] sm:$0xff]  ;;  %v1080_v22 = vld [vmem:[%s5472_s0 + $0xbd0] sm:$0xff] }
  0xb2   :  { %3063 = vmatprep.subr.mxu1 %v1013_v19  ;;  %3108 = vmatprep.subr.mxu0 %v1040_v25  ;;  %v1109_v19 = vld [vmem:[%s5472_s0 + $0xcb8] sm:$0xff]  ;;  %v1092_v25 = vld [vmem:[%s5472_s0 + $0xc30] sm:$0xff] }
  0xb3   :  { %3064 = vmatpush3.msra.mxu1 %v997_v21  ;;  %3109 = vmatpush3.msra.mxu0 %v1024_v27  ;;  %v1093_v21 = vld [vmem:[%s5472_s0 + $0xc38] sm:$0xff]  ;;  %v1107_v27 = vld [vmem:[%s5472_s0 + $0xca8] sm:$0xff] }
  0xb4   :  { %3065 = vmatprep.subr.mxu1 %v1012_v24  ;;  %3110 = vmatprep.subr.mxu0 %v1039_v30  ;;  %v1064_v24 = vld [vmem:[%s5472_s0 + $0xb50] sm:$0xff]  ;;  %v1078_v30 = vld [vmem:[%s5472_s0 + $0xbc0] sm:$0xff] }
  0xb5   :  { %3066 = vmatpush3.msra.mxu1 %v996_v26  ;;  %3111 = vmatpush3.msra.mxu0 %v1023_v33  ;;  %v1079_v26 = vld [vmem:[%s5472_s0 + $0xbc8] sm:$0xff]  ;;  %v1090_v33 = vld [vmem:[%s5472_s0 + $0xc20] sm:$0xff] }
  0xb6   :  { %3067 = vmatprep.subr.mxu1 %v1011_v29  ;;  %3112 = vmatprep.subr.mxu0 %v1038_v35  ;;  %v1091_v29 = vld [vmem:[%s5472_s0 + $0xc28] sm:$0xff]  ;;  %v1105_v35 = vld [vmem:[%s5472_s0 + $0xc98] sm:$0xff] }
  0xb7   :  { %3068 = vmatpush3.msra.mxu1 %v995_v32  ;;  %3113 = vmatpush3.msra.mxu0 %v1022_v38  ;;  %v1062_v32 = vld [vmem:[%s5472_s0 + $0xb40] sm:$0xff]  ;;  %v2713_v38 = vld [vmem:[%s5475_s3 + $0x32] sm:$0x3] }
  0xb8   :  { %3069 = vmatprep.subr.mxu1 %v1010_v34  ;;  %2077 = vmatprep.mubr.f32.mxu0 %v685_v39  ;;  %v1077_v34 = vld [vmem:[%s5472_s0 + $0xbb8] sm:$0xff]  ;;  %v1076_v39 = vld [vmem:[%s5472_s0 + $0xbb0] sm:$0xff]  ;;  %v424_v46 = vsel %vm24_vm0, %v2713_v38, %v3399_v0 }
  0xb9   :  { %3070 = vmatpush3.msra.mxu1 %v994_v37  ;;  %3152 = vmatprep.subr.mxu0 %v1117_v41  ;;  %v1089_v37 = vld [vmem:[%s5472_s0 + $0xc18] sm:$0xff]  ;;  %v1060_v41 = vld [vmem:[%s5472_s0 + $0xb30] sm:$0xff]  ;;  %v689_v54 = vmax.f32 %v424_v46, 0.0  ;;  %v1170_v46 = vld [vmem:[%s5472_s0 + $0xea0] sm:$0xff] }
  0xba   :  { %3071 = vmatprep.subr.mxu1 %v1009_v40  ;;  %2078 = vmatmul.mubr.f32.vlgmr.msra.gmra.mxu0 %v684_v43  ;;  %v1104_v40 = vld [vmem:[%s5472_s0 + $0xc90] sm:$0xff] }
  0xbb   :  { %3072 = vmatpush3.msra.mxu1 %v993_v42  ;;  %3153 = vmatpush3.msra.mxu0 %v1101_v47  ;;  %v1088_v42 = vld [vmem:[%s5472_s0 + $0xc10] sm:$0xff]  ;;  %v1059_v47 = vld [vmem:[%s5472_s0 + $0xb28] sm:$0xff] }
  0xbc   :  { %3073 = vmatprep.subr.mxu1 %v1008_v45  ;;  %3154 = vmatprep.subr.mxu0 %v1116_v49  ;;  %v2712_v43 = vld [vmem:[%s5475_s3 + $0x30] sm:$0x3]  ;;  %v1103_v45 = vld [vmem:[%s5472_s0 + $0xc88] sm:$0xff]  ;;  %v1074_v49 = vld [vmem:[%s5472_s0 + $0xba0] sm:$0xff] }
  0xbd   :  { %3074 = vmatpush3.msra.mxu1 %v992_v48  ;;  %3155 = vmatpush3.msra.mxu0 %v1100_v52  ;;  %v1087_v48 = vld [vmem:[%s5472_s0 + $0xc08] sm:$0xff]  ;;  %v408_v51 = vsel %vm24_vm0, %v2712_v43, %v3399_v0  ;;  %v1058_v52 = vld [vmem:[%s5472_s0 + $0xb20] sm:$0xff]  ;;  %v1172_v38 = vld [vmem:[%s5472_s0 + $0xeb0] sm:$0xff] }
  0xbe   :  { %3075 = vmatprep.subr.mxu1 %v1007_v50  ;;  %3156 = vmatprep.subr.mxu0 %v1115_v55  ;;  %v1102_v50 = vld [vmem:[%s5472_s0 + $0xc80] sm:$0xff]  ;;  %v1073_v55 = vld [vmem:[%s5472_s0 + $0xb98] sm:$0xff]  ;;  %v1127_v43 = vld [vmem:[%s5472_s0 + $0xd48] sm:$0xff] }
  0xbf   :  { %3076 = vmatpush3.msra.mxu1 %v991_v53  ;;  %3157 = vmatpush3.msra.mxu0 %v1099_v57  ;;  %v1086_v53 = vld [vmem:[%s5472_s0 + $0xc00] sm:$0xff]  ;;  %v1057_v57 = vld [vmem:[%s5472_s0 + $0xb18] sm:$0xff] }
  0xc0   :  { %3077 = vmatprep.subr.mxu1 %v1006_v56  ;;  %3158 = vmatprep.subr.mxu0 %v1114_v60  ;;  %v1181_v56 = vld [vmem:[%s5472_s0 + $0xef8] sm:$0xff]  ;;  %v1072_v60 = vld [vmem:[%s5472_s0 + $0xb90] sm:$0xff] }
  0xc1   :  { %3078 = vmatpush3.msra.mxu1 %v990_v58  ;;  %2007 = vmatprep.mubr.f32.mxu1 %v683_v59  ;;  %v688_v58 = vmax.f32 %v408_v51, 0.0  ;;  %v2711_v59 = vld [vmem:[%s5475_s3 + $0x2e] sm:$0x3]  ;;  %v1125_v51 = vld [vmem:[%s5472_s0 + $0xd38] sm:$0xff] }
  0xc2   :  { %3159 = vmatpush3.msra.mxu0 %v1098_v62  ;;  %2008 = vmatmul.mubr.f32.vlgmr.msra.gmra.mxu1 %v682_v61  ;;  %v2710_v61 = vld [vmem:[%s5475_s3 + $0x2c] sm:$0x3]  ;;  %v1165_v62 = vld [vmem:[%s5472_s0 + $0xe78] sm:$0xff] }
  0xc3   :  { %3117 = vmatprep.subr.mxu1 %v1085_v63  ;;  %3160 = vmatprep.subr.mxu0 %v1113_v1  ;;  %v1056_v63 = vld [vmem:[%s5472_s0 + $0xb10] sm:$0xff] }
  0xc4   :  { %3118 = vmatpush3.msra.mxu1 %v1069_v2  ;;  %3161 = vmatpush3.msra.mxu0 %v1097_v3  ;;  %v1180_v1 = vld [vmem:[%s5472_s0 + $0xef0] sm:$0xff]  ;;  %v1071_v2 = vld [vmem:[%s5472_s0 + $0xb88] sm:$0xff]  ;;  %v392_v3 = vsel %vm24_vm0, %v2711_v59, %v3399_v0 }
  0xc5   :  { %3119 = vmatprep.subr.mxu1 %v1084_v4  ;;  %3162 = vmatprep.subr.mxu0 %v1112_v5  ;;  %v1164_v4 = vld [vmem:[%s5472_s0 + $0xe70] sm:$0xff]  ;;  %v1055_v5 = vld [vmem:[%s5472_s0 + $0xb08] sm:$0xff] }
  0xc6   :  { %3120 = vmatpush3.msra.mxu1 %v1068_v6  ;;  %3163 = vmatpush3.msra.mxu0 %v1096_v8  ;;  %v376_v6 = vsel %vm24_vm0, %v2710_v61, %v3399_v0  ;;  %v1179_v8 = vld [vmem:[%s5472_s0 + $0xee8] sm:$0xff] }
  0xc7   :  { %3121 = vmatprep.subr.mxu1 %v1083_v9  ;;  %3164 = vmatprep.subr.mxu0 %v1111_v10  ;;  %v1070_v9 = vld [vmem:[%s5472_s0 + $0xb80] sm:$0xff]  ;;  %v1163_v10 = vld [vmem:[%s5472_s0 + $0xe68] sm:$0xff] }
  0xc8   :  { %3122 = vmatpush3.msra.mxu1 %v1067_v11  ;;  %3165 = vmatpush3.msra.mxu0 %v1095_v13  ;;  %v1054_v11 = vld [vmem:[%s5472_s0 + $0xb00] sm:$0xff]  ;;  %v687_v13 = vmax.f32 %v392_v3, 0.0  ;;  %v1139_v59 = vld [vmem:[%s5472_s0 + $0xda8] sm:$0xff] }
  0xc9   :  { %3123 = vmatprep.subr.mxu1 %v1082_v14  ;;  %3166 = vmatprep.subr.mxu0 %v1110_v15  ;;  %v1178_v14 = vld [vmem:[%s5472_s0 + $0xee0] sm:$0xff]  ;;  %v686_v15 = vmax.f32 %v376_v6, 0.0 }
  0xca   :  { %3124 = vmatpush3.msra.mxu1 %v1066_v16  ;;  %3167 = vmatpush3.msra.mxu0 %v1094_v17  ;;  %v1162_v16 = vld [vmem:[%s5472_s0 + $0xe60] sm:$0xff]  ;;  %v1149_v17 = vld [vmem:[%s5472_s0 + $0xdf8] sm:$0xff] }
  0xcb   :  { %3125 = vmatprep.subr.mxu1 %v1081_v18  ;;  %3168 = vmatprep.subr.mxu0 %v1109_v19  ;;  %v1177_v18 = vld [vmem:[%s5472_s0 + $0xed8] sm:$0xff] }
  0xcc   :  { %3126 = vmatpush3.msra.mxu1 %v1065_v20  ;;  %3169 = vmatpush3.msra.mxu0 %v1093_v21  ;;  %v1133_v19 = vld [vmem:[%s5472_s0 + $0xd78] sm:$0xff]  ;;  %v1148_v21 = vld [vmem:[%s5472_s0 + $0xdf0] sm:$0xff] }
  0xcd   :  { %3127 = vmatprep.subr.mxu1 %v1080_v22  ;;  %3170 = vmatprep.subr.mxu0 %v1108_v23  ;;  %v1161_v20 = vld [vmem:[%s5472_s0 + $0xe58] sm:$0xff]  ;;  %v1176_v22 = vld [vmem:[%s5472_s0 + $0xed0] sm:$0xff] }
  0xce   :  { %3128 = vmatpush3.msra.mxu1 %v1064_v24  ;;  %3171 = vmatpush3.msra.mxu0 %v1092_v25  ;;  %v1132_v23 = vld [vmem:[%s5472_s0 + $0xd70] sm:$0xff]  ;;  %v1147_v25 = vld [vmem:[%s5472_s0 + $0xde8] sm:$0xff] }
  0xcf   :  { %3129 = vmatprep.subr.mxu1 %v1079_v26  ;;  %3172 = vmatprep.subr.mxu0 %v1107_v27  ;;  %v1160_v24 = vld [vmem:[%s5472_s0 + $0xe50] sm:$0xff]  ;;  %v1175_v26 = vld [vmem:[%s5472_s0 + $0xec8] sm:$0xff] }
  0xd0   :  { %3130 = vmatpush3.msra.mxu1 %v1063_v28  ;;  %3173 = vmatpush3.msra.mxu0 %v1091_v29  ;;  %v1131_v27 = vld [vmem:[%s5472_s0 + $0xd68] sm:$0xff]  ;;  %v1146_v29 = vld [vmem:[%s5472_s0 + $0xde0] sm:$0xff] }
  0xd1   :  { %3131 = vmatprep.subr.mxu1 %v1078_v30  ;;  %3174 = vmatprep.subr.mxu0 %v1106_v31  ;;  %v1159_v28 = vld [vmem:[%s5472_s0 + $0xe48] sm:$0xff]  ;;  %v1174_v30 = vld [vmem:[%s5472_s0 + $0xec0] sm:$0xff] }
  0xd2   :  { %3132 = vmatpush3.msra.mxu1 %v1062_v32  ;;  %3175 = vmatpush3.msra.mxu0 %v1090_v33  ;;  %v1130_v31 = vld [vmem:[%s5472_s0 + $0xd60] sm:$0xff]  ;;  %v1145_v33 = vld [vmem:[%s5472_s0 + $0xdd8] sm:$0xff] }
  0xd3   :  { %3133 = vmatprep.subr.mxu1 %v1077_v34  ;;  %3176 = vmatprep.subr.mxu0 %v1105_v35  ;;  %v1158_v32 = vld [vmem:[%s5472_s0 + $0xe40] sm:$0xff]  ;;  %v1173_v34 = vld [vmem:[%s5472_s0 + $0xeb8] sm:$0xff] }
  0xd4   :  { %3134 = vmatpush3.msra.mxu1 %v1061_v36  ;;  %3177 = vmatpush3.msra.mxu0 %v1089_v37  ;;  %v1129_v35 = vld [vmem:[%s5472_s0 + $0xd58] sm:$0xff]  ;;  %v1144_v37 = vld [vmem:[%s5472_s0 + $0xdd0] sm:$0xff] }
  0xd5   :  { %3135 = vmatprep.subr.mxu1 %v1076_v39  ;;  %3178 = vmatprep.subr.mxu0 %v1104_v40  ;;  %v1157_v36 = vld [vmem:[%s5472_s0 + $0xe38] sm:$0xff]  ;;  %v1128_v39 = vld [vmem:[%s5472_s0 + $0xd50] sm:$0xff] }
  0xd6   :  { %3136 = vmatpush3.msra.mxu1 %v1060_v41  ;;  %3179 = vmatpush3.msra.mxu0 %v1088_v42  ;;  %v1156_v40 = vld [vmem:[%s5472_s0 + $0xe30] sm:$0xff]  ;;  %v1143_v41 = vld [vmem:[%s5472_s0 + $0xdc8] sm:$0xff] }
  0xd7   :  { %3137 = vmatprep.subr.mxu1 %v1075_v44  ;;  %3180 = vmatprep.subr.mxu0 %v1103_v45  ;;  %v1171_v42 = vld [vmem:[%s5472_s0 + $0xea8] sm:$0xff]  ;;  %v1142_v45 = vld [vmem:[%s5472_s0 + $0xdc0] sm:$0xff] }
  0xd8   :  { %3138 = vmatpush3.msra.mxu1 %v1059_v47  ;;  %3181 = vmatpush3.msra.mxu0 %v1087_v48  ;;  %v1155_v44 = vld [vmem:[%s5472_s0 + $0xe28] sm:$0xff]  ;;  %v1126_v47 = vld [vmem:[%s5472_s0 + $0xd40] sm:$0xff] }
  0xd9   :  { %3139 = vmatprep.subr.mxu1 %v1074_v49  ;;  %3182 = vmatprep.subr.mxu0 %v1102_v50  ;;  %v1154_v48 = vld [vmem:[%s5472_s0 + $0xe20] sm:$0xff]  ;;  %v1141_v49 = vld [vmem:[%s5472_s0 + $0xdb8] sm:$0xff] }
  0xda   :  { %3140 = vmatpush3.msra.mxu1 %v1058_v52  ;;  %3183 = vmatpush3.msra.mxu0 %v1086_v53  ;;  %v1169_v50 = vld [vmem:[%s5472_s0 + $0xe98] sm:$0xff] }
  0xdb   :  { %3141 = vmatprep.subr.mxu1 %v1073_v55  ;;  %2217 = vmatprep.mubr.f32.mxu0 %v689_v54  ;;  %v1153_v52 = vld [vmem:[%s5472_s0 + $0xe18] sm:$0xff]  ;;  %v1140_v54 = vld [vmem:[%s5472_s0 + $0xdb0] sm:$0xff] }
  0xdc   :  { %3222 = vmatprep.subr.mxu0 %v1181_v56  ;;  %3142 = vmatpush3.msra.mxu1 %v1057_v57  ;;  %v2717_v53 = vld [vmem:[%s5475_s3 + $0x3a] sm:$0x3]  ;;  %v1168_v55 = vld [vmem:[%s5472_s0 + $0xe90] sm:$0xff] }
  0xdd   :  { %2218 = vmatmul.mubr.f32.vlgmr.msra.gmra.mxu0 %v688_v58  ;;  %3143 = vmatprep.subr.mxu1 %v1072_v60  ;;  %v1124_v56 = vld [vmem:[%s5472_s0 + $0xd30] sm:$0xff]  ;;  %v2716_v58 = vld [vmem:[%s5475_s3 + $0x38] sm:$0x3]  ;;  %v1167_v60 = vld [vmem:[%s5472_s0 + $0xe88] sm:$0xff]  ;;  %v488_v61 = vsel %vm24_vm0, %v2717_v53, %v3399_v0 }
  0xde   :  { %3223 = vmatpush3.msra.mxu0 %v1165_v62  ;;  %3144 = vmatpush3.msra.mxu1 %v1056_v63  ;;  %v1152_v57 = vld [vmem:[%s5472_s0 + $0xe10] sm:$0xff]  ;;  %v1123_v62 = vld [vmem:[%s5472_s0 + $0xd28] sm:$0xff]  ;;  %v472_v3 = vsel %vm24_vm0, %v2716_v58, %v3399_v0  ;;  %v693_v6 = vmax.f32 %v488_v61, 0.0  ;;  %v1234_v61 = vld [vmem:[%s5472_s0 + $0x10a0] sm:$0xff] }
  0xdf   :  { %3224 = vmatprep.subr.mxu0 %v1180_v1  ;;  %3145 = vmatprep.subr.mxu1 %v1071_v2  ;;  %v1151_v63 = vld [vmem:[%s5472_s0 + $0xe08] sm:$0xff]  ;;  %v1138_v1 = vld [vmem:[%s5472_s0 + $0xda0] sm:$0xff]  ;;  %v1236_v53 = vld [vmem:[%s5472_s0 + $0x10b0] sm:$0xff] }
  0xe0   :  { %3225 = vmatpush3.msra.mxu0 %v1164_v4  ;;  %3146 = vmatpush3.msra.mxu1 %v1055_v5  ;;  %v1166_v2 = vld [vmem:[%s5472_s0 + $0xe80] sm:$0xff]  ;;  %v1191_v58 = vld [vmem:[%s5472_s0 + $0xf48] sm:$0xff] }
  0xe1   :  { %3226 = vmatprep.subr.mxu0 %v1179_v8  ;;  %3147 = vmatprep.subr.mxu1 %v1070_v9  ;;  %v1122_v4 = vld [vmem:[%s5472_s0 + $0xd20] sm:$0xff]  ;;  %v1137_v8 = vld [vmem:[%s5472_s0 + $0xd98] sm:$0xff] }
  0xe2   :  { %3227 = vmatpush3.msra.mxu0 %v1163_v10  ;;  %3148 = vmatpush3.msra.mxu1 %v1054_v11  ;;  %v1150_v5 = vld [vmem:[%s5472_s0 + $0xe00] sm:$0xff]  ;;  %v1245_v9 = vld [vmem:[%s5472_s0 + $0x10f8] sm:$0xff]  ;;  %v692_v11 = vmax.f32 %v472_v3, 0.0 }
  0xe3   :  { %3228 = vmatprep.subr.mxu0 %v1178_v14  ;;  %2147 = vmatprep.mubr.f32.mxu1 %v687_v13  ;;  %v1121_v10 = vld [vmem:[%s5472_s0 + $0xd18] sm:$0xff]  ;;  %v2715_v13 = vld [vmem:[%s5475_s3 + $0x36] sm:$0x3] }
  0xe4   :  { %3229 = vmatpush3.msra.mxu0 %v1162_v16  ;;  %2148 = vmatmul.mubr.f32.vlgmr.msra.gmra.mxu1 %v686_v15  ;;  %v1136_v14 = vld [vmem:[%s5472_s0 + $0xd90] sm:$0xff]  ;;  %v1229_v16 = vld [vmem:[%s5472_s0 + $0x1078] sm:$0xff] }
  0xe5   :  { %3187 = vmatprep.subr.mxu1 %v1149_v17  ;;  %3230 = vmatprep.subr.mxu0 %v1177_v18  ;;  %v2714_v15 = vld [vmem:[%s5475_s3 + $0x34] sm:$0x3]  ;;  %v1189_v3 = vld [vmem:[%s5472_s0 + $0xf38] sm:$0xff] }
  0xe6   :  { %3188 = vmatpush3.msra.mxu1 %v1133_v19  ;;  %3231 = vmatpush3.msra.mxu0 %v1161_v20  ;;  %v1120_v17 = vld [vmem:[%s5472_s0 + $0xd10] sm:$0xff]  ;;  %v1135_v19 = vld [vmem:[%s5472_s0 + $0xd88] sm:$0xff]  ;;  %v456_v20 = vsel %vm24_vm0, %v2715_v13, %v3399_v0 }
  0xe7   :  { %3189 = vmatprep.subr.mxu1 %v1148_v21  ;;  %3232 = vmatprep.subr.mxu0 %v1176_v22  ;;  %v1244_v18 = vld [vmem:[%s5472_s0 + $0x10f0] sm:$0xff]  ;;  %v1119_v22 = vld [vmem:[%s5472_s0 + $0xd08] sm:$0xff] }
  0xe8   :  { %3190 = vmatpush3.msra.mxu1 %v1132_v23  ;;  %3233 = vmatpush3.msra.mxu0 %v1160_v24  ;;  %v1228_v21 = vld [vmem:[%s5472_s0 + $0x1070] sm:$0xff]  ;;  %v440_v23 = vsel %vm24_vm0, %v2714_v15, %v3399_v0  ;;  %v1243_v24 = vld [vmem:[%s5472_s0 + $0x10e8] sm:$0xff] }
  0xe9   :  { %3191 = vmatprep.subr.mxu1 %v1147_v25  ;;  %3234 = vmatprep.subr.mxu0 %v1175_v26  ;;  %v1134_v25 = vld [vmem:[%s5472_s0 + $0xd80] sm:$0xff]  ;;  %v1227_v26 = vld [vmem:[%s5472_s0 + $0x1068] sm:$0xff] }
  0xea   :  { %3192 = vmatpush3.msra.mxu1 %v1131_v27  ;;  %3235 = vmatpush3.msra.mxu0 %v1159_v28  ;;  %v1118_v27 = vld [vmem:[%s5472_s0 + $0xd00] sm:$0xff]  ;;  %v691_v28 = vmax.f32 %v456_v20, 0.0  ;;  %v1203_v13 = vld [vmem:[%s5472_s0 + $0xfa8] sm:$0xff] }
  0xeb   :  { %3193 = vmatprep.subr.mxu1 %v1146_v29  ;;  %3236 = vmatprep.subr.mxu0 %v1174_v30  ;;  %v1242_v29 = vld [vmem:[%s5472_s0 + $0x10e0] sm:$0xff]  ;;  %v690_v30 = vmax.f32 %v440_v23, 0.0 }
  0xec   :  { %3194 = vmatpush3.msra.mxu1 %v1130_v31  ;;  %3237 = vmatpush3.msra.mxu0 %v1158_v32  ;;  %v1226_v31 = vld [vmem:[%s5472_s0 + $0x1060] sm:$0xff]  ;;  %v1213_v32 = vld [vmem:[%s5472_s0 + $0xff8] sm:$0xff] }
  0xed   :  { %3195 = vmatprep.subr.mxu1 %v1145_v33  ;;  %3238 = vmatprep.subr.mxu0 %v1173_v34  ;;  %v1241_v33 = vld [vmem:[%s5472_s0 + $0x10d8] sm:$0xff] }
  0xee   :  { %3196 = vmatpush3.msra.mxu1 %v1129_v35  ;;  %3239 = vmatpush3.msra.mxu0 %v1157_v36  ;;  %v1197_v34 = vld [vmem:[%s5472_s0 + $0xf78] sm:$0xff]  ;;  %v1212_v36 = vld [vmem:[%s5472_s0 + $0xff0] sm:$0xff] }
  0xef   :  { %3197 = vmatprep.subr.mxu1 %v1144_v37  ;;  %3240 = vmatprep.subr.mxu0 %v1172_v38  ;;  %v1225_v35 = vld [vmem:[%s5472_s0 + $0x1058] sm:$0xff]  ;;  %v1240_v37 = vld [vmem:[%s5472_s0 + $0x10d0] sm:$0xff] }
  0xf0   :  { %3198 = vmatpush3.msra.mxu1 %v1128_v39  ;;  %3241 = vmatpush3.msra.mxu0 %v1156_v40  ;;  %v1196_v38 = vld [vmem:[%s5472_s0 + $0xf70] sm:$0xff]  ;;  %v1211_v40 = vld [vmem:[%s5472_s0 + $0xfe8] sm:$0xff] }
  0xf1   :  { %3199 = vmatprep.subr.mxu1 %v1143_v41  ;;  %3242 = vmatprep.subr.mxu0 %v1171_v42  ;;  %v1224_v39 = vld [vmem:[%s5472_s0 + $0x1050] sm:$0xff]  ;;  %v1239_v41 = vld [vmem:[%s5472_s0 + $0x10c8] sm:$0xff] }
  0xf2   :  { %3200 = vmatpush3.msra.mxu1 %v1127_v43  ;;  %3243 = vmatpush3.msra.mxu0 %v1155_v44  ;;  %v1195_v42 = vld [vmem:[%s5472_s0 + $0xf68] sm:$0xff]  ;;  %v1210_v44 = vld [vmem:[%s5472_s0 + $0xfe0] sm:$0xff] }
  0xf3   :  { %3201 = vmatprep.subr.mxu1 %v1142_v45  ;;  %3244 = vmatprep.subr.mxu0 %v1170_v46  ;;  %v1223_v43 = vld [vmem:[%s5472_s0 + $0x1048] sm:$0xff]  ;;  %v1238_v45 = vld [vmem:[%s5472_s0 + $0x10c0] sm:$0xff] }
  0xf4   :  { %3202 = vmatpush3.msra.mxu1 %v1126_v47  ;;  %3245 = vmatpush3.msra.mxu0 %v1154_v48  ;;  %v1194_v46 = vld [vmem:[%s5472_s0 + $0xf60] sm:$0xff]  ;;  %v1209_v48 = vld [vmem:[%s5472_s0 + $0xfd8] sm:$0xff] }
  0xf5   :  { %3203 = vmatprep.subr.mxu1 %v1141_v49  ;;  %3246 = vmatprep.subr.mxu0 %v1169_v50  ;;  %v1222_v47 = vld [vmem:[%s5472_s0 + $0x1040] sm:$0xff]  ;;  %v1237_v49 = vld [vmem:[%s5472_s0 + $0x10b8] sm:$0xff] }
  0xf6   :  { %3204 = vmatpush3.msra.mxu1 %v1125_v51  ;;  %3247 = vmatpush3.msra.mxu0 %v1153_v52  ;;  %v1193_v50 = vld [vmem:[%s5472_s0 + $0xf58] sm:$0xff]  ;;  %v1208_v52 = vld [vmem:[%s5472_s0 + $0xfd0] sm:$0xff] }
  0xf7   :  { %3205 = vmatprep.subr.mxu1 %v1140_v54  ;;  %3248 = vmatprep.subr.mxu0 %v1168_v55  ;;  %v1221_v51 = vld [vmem:[%s5472_s0 + $0x1038] sm:$0xff]  ;;  %v1192_v54 = vld [vmem:[%s5472_s0 + $0xf50] sm:$0xff] }
  0xf8   :  { %3206 = vmatpush3.msra.mxu1 %v1124_v56  ;;  %3249 = vmatpush3.msra.mxu0 %v1152_v57  ;;  %v1220_v55 = vld [vmem:[%s5472_s0 + $0x1030] sm:$0xff]  ;;  %v1207_v56 = vld [vmem:[%s5472_s0 + $0xfc8] sm:$0xff] }
  0xf9   :  { %3207 = vmatprep.subr.mxu1 %v1139_v59  ;;  %3250 = vmatprep.subr.mxu0 %v1167_v60  ;;  %v1235_v57 = vld [vmem:[%s5472_s0 + $0x10a8] sm:$0xff]  ;;  %v1206_v60 = vld [vmem:[%s5472_s0 + $0xfc0] sm:$0xff] }
  0xfa   :  { %3208 = vmatpush3.msra.mxu1 %v1123_v62  ;;  %3251 = vmatpush3.msra.mxu0 %v1151_v63  ;;  %v1219_v59 = vld [vmem:[%s5472_s0 + $0x1028] sm:$0xff]  ;;  %v1190_v62 = vld [vmem:[%s5472_s0 + $0xf40] sm:$0xff] }
  0xfb   :  { %3209 = vmatprep.subr.mxu1 %v1138_v1  ;;  %3252 = vmatprep.subr.mxu0 %v1166_v2  ;;  %v1218_v63 = vld [vmem:[%s5472_s0 + $0x1020] sm:$0xff]  ;;  %v1205_v1 = vld [vmem:[%s5472_s0 + $0xfb8] sm:$0xff] }
  0xfc   :  { %3210 = vmatpush3.msra.mxu1 %v1122_v4  ;;  %3253 = vmatpush3.msra.mxu0 %v1150_v5  ;;  %v1233_v2 = vld [vmem:[%s5472_s0 + $0x1098] sm:$0xff]  ;;  %v2721_v5 = vld [vmem:[%s5475_s3 + $0x42] sm:$0x3] }
  0xfd   :  { %3211 = vmatprep.subr.mxu1 %v1137_v8  ;;  %2357 = vmatprep.mubr.f32.mxu0 %v693_v6  ;;  %v1217_v4 = vld [vmem:[%s5472_s0 + $0x1018] sm:$0xff]  ;;  %v1204_v6 = vld [vmem:[%s5472_s0 + $0xfb0] sm:$0xff]  ;;  %v552_v15 = vsel %vm24_vm0, %v2721_v5, %v3399_v0 }
  0xfe   :  { %3292 = vmatprep.subr.mxu0 %v1245_v9  ;;  %3212 = vmatpush3.msra.mxu1 %v1121_v10  ;;  %v1232_v8 = vld [vmem:[%s5472_s0 + $0x1090] sm:$0xff]  ;;  %v697_v23 = vmax.f32 %v552_v15, 0.0  ;;  %v1269_v5 = vld [vmem:[%s5472_s0 + $0x11b8] sm:$0xff]  ;;  %v1279_v15 = vld [vmem:[%s5472_s0 + $0x1208] sm:$0xff] }
  0xff   :  { %2358 = vmatmul.mubr.f32.vlgmr.msra.gmra.mxu0 %v692_v11  ;;  %3213 = vmatprep.subr.mxu1 %v1136_v14  ;;  %v1188_v9 = vld [vmem:[%s5472_s0 + $0xf30] sm:$0xff]  ;;  %v2720_v11 = vld [vmem:[%s5475_s3 + $0x40] sm:$0x3]  ;;  %v1231_v14 = vld [vmem:[%s5472_s0 + $0x1088] sm:$0xff] }
 0x100   :  { %3293 = vmatpush3.msra.mxu0 %v1229_v16  ;;  %3214 = vmatpush3.msra.mxu1 %v1120_v17  ;;  %v1216_v10 = vld [vmem:[%s5472_s0 + $0x1010] sm:$0xff]  ;;  %v1187_v16 = vld [vmem:[%s5472_s0 + $0xf28] sm:$0xff]  ;;  %v536_v20 = vsel %vm24_vm0, %v2720_v11, %v3399_v0 }
 0x101   :  { %3294 = vmatprep.subr.mxu0 %v1244_v18  ;;  %3215 = vmatprep.subr.mxu1 %v1135_v19  ;;  %v1215_v17 = vld [vmem:[%s5472_s0 + $0x1008] sm:$0xff]  ;;  %v1202_v18 = vld [vmem:[%s5472_s0 + $0xfa0] sm:$0xff]  ;;  %v1252_v11 = vld [vmem:[%s5472_s0 + $0x1130] sm:$0xff] }
 0x102   :  { %3295 = vmatpush3.msra.mxu0 %v1228_v21  ;;  %3216 = vmatpush3.msra.mxu1 %v1119_v22  ;;  %v1230_v19 = vld [vmem:[%s5472_s0 + $0x1080] sm:$0xff] }
 0x103   :  { %3296 = vmatprep.subr.mxu0 %v1243_v24  ;;  %3217 = vmatprep.subr.mxu1 %v1134_v25  ;;  %v1186_v21 = vld [vmem:[%s5472_s0 + $0xf20] sm:$0xff]  ;;  %v1201_v24 = vld [vmem:[%s5472_s0 + $0xf98] sm:$0xff] }
 0x104   :  { %3297 = vmatpush3.msra.mxu0 %v1227_v26  ;;  %3218 = vmatpush3.msra.mxu1 %v1118_v27  ;;  %v1214_v22 = vld [vmem:[%s5472_s0 + $0x1000] sm:$0xff]  ;;  %v1185_v25 = vld [vmem:[%s5472_s0 + $0xf18] sm:$0xff]  ;;  %v696_v26 = vmax.f32 %v536_v20, 0.0  ;;  %v2725_v20 = vld [vmem:[%s5475_s3 + $0x4a] sm:$0x3] }
 0x105   :  { %3298 = vmatprep.subr.mxu0 %v1242_v29  ;;  %2287 = vmatprep.mubr.f32.mxu1 %v691_v28  ;;  %v2719_v27 = vld [vmem:[%s5475_s3 + $0x3e] sm:$0x3]  ;;  %v1200_v28 = vld [vmem:[%s5472_s0 + $0xf90] sm:$0xff]  ;;  %v2718_v29 = vld [vmem:[%s5475_s3 + $0x3c] sm:$0x3] }
 0x106   :  { %3299 = vmatpush3.msra.mxu0 %v1226_v31  ;;  %2288 = vmatmul.mubr.f32.vlgmr.msra.gmra.mxu1 %v690_v30  ;;  %v1293_v30 = vld [vmem:[%s5472_s0 + $0x1278] sm:$0xff]  ;;  %v1184_v31 = vld [vmem:[%s5472_s0 + $0xf10] sm:$0xff] }
 0x107   :  { %3257 = vmatprep.subr.mxu1 %v1213_v32  ;;  %3300 = vmatprep.subr.mxu0 %v1241_v33  ;;  %v3365_v32 = vmov 0.0   ;;  %v1199_v33 = vld [vmem:[%s5472_s0 + $0xf88] sm:$0xff] }
 0x108   :  { %3258 = vmatpush3.msra.mxu1 %v1197_v34  ;;  %3301 = vmatpush3.msra.mxu0 %v1225_v35  ;;  %v520_v34 = vsel %vm24_vm0, %v2719_v27, %v3399_v0  ;;  %v1292_v35 = vld [vmem:[%s5472_s0 + $0x1270] sm:$0xff]  ;;  %v616_v27 = vsel %vm24_vm0, %v2725_v20, %v3399_v0 }
 0x109   :  { %3259 = vmatprep.subr.mxu1 %v1212_v36  ;;  %3302 = vmatprep.subr.mxu0 %v1240_v37  ;;  %v1183_v36 = vld [vmem:[%s5472_s0 + $0xf08] sm:$0xff]  ;;  %v504_v37 = vsel %vm24_vm0, %v2718_v29, %v3399_v0  ;;  %v1298_v29 = vld [vmem:[%s5472_s0 + $0x12a0] sm:$0xff] }
 0x10a   :  { %3260 = vmatpush3.msra.mxu1 %v1196_v38  ;;  %3303 = vmatpush3.msra.mxu0 %v1224_v39  ;;  %v1198_v38 = vld [vmem:[%s5472_s0 + $0xf80] sm:$0xff]  ;;  %v1291_v39 = vld [vmem:[%s5472_s0 + $0x1268] sm:$0xff] }
 0x10b   :  { %3261 = vmatprep.subr.mxu1 %v1211_v40  ;;  %3304 = vmatprep.subr.mxu0 %v1239_v41  ;;  %v1182_v40 = vld [vmem:[%s5472_s0 + $0xf00] sm:$0xff]  ;;  %v695_v41 = vmax.f32 %v520_v34, 0.0  ;;  %v1247_v34 = vld [vmem:[%s5472_s0 + $0x1108] sm:$0xff] }
 0x10c   :  { %3262 = vmatpush3.msra.mxu1 %v1195_v42  ;;  %3305 = vmatpush3.msra.mxu0 %v1223_v43  ;;  %v694_v42 = vmax.f32 %v504_v37, 0.0  ;;  %v1290_v43 = vld [vmem:[%s5472_s0 + $0x1260] sm:$0xff] }
 0x10d   :  { %3263 = vmatprep.subr.mxu1 %v1210_v44  ;;  %3306 = vmatprep.subr.mxu0 %v1238_v45  ;;  %v1277_v44 = vld [vmem:[%s5472_s0 + $0x11f8] sm:$0xff]  ;;  %v1262_v37 = vld [vmem:[%s5472_s0 + $0x1180] sm:$0xff] }
 0x10e   :  { %3264 = vmatpush3.msra.mxu1 %v1194_v46  ;;  %3307 = vmatpush3.msra.mxu0 %v1222_v47  ;;  %v1261_v45 = vld [vmem:[%s5472_s0 + $0x1178] sm:$0xff]  ;;  %v1276_v47 = vld [vmem:[%s5472_s0 + $0x11f0] sm:$0xff] }
 0x10f   :  { %3265 = vmatprep.subr.mxu1 %v1209_v48  ;;  %3308 = vmatprep.subr.mxu0 %v1237_v49  ;;  %v1289_v46 = vld [vmem:[%s5472_s0 + $0x1258] sm:$0xff]  ;;  %v1260_v48 = vld [vmem:[%s5472_s0 + $0x1170] sm:$0xff] }
 0x110   :  { %3266 = vmatpush3.msra.mxu1 %v1193_v50  ;;  %3309 = vmatpush3.msra.mxu0 %v1221_v51  ;;  %v1288_v49 = vld [vmem:[%s5472_s0 + $0x1250] sm:$0xff]  ;;  %v1275_v50 = vld [vmem:[%s5472_s0 + $0x11e8] sm:$0xff] }
 0x111   :  { %3267 = vmatprep.subr.mxu1 %v1208_v52  ;;  %3310 = vmatprep.subr.mxu0 %v1236_v53  ;;  %v1259_v51 = vld [vmem:[%s5472_s0 + $0x1168] sm:$0xff]  ;;  %v1274_v53 = vld [vmem:[%s5472_s0 + $0x11e0] sm:$0xff] }
 0x112   :  { %3268 = vmatpush3.msra.mxu1 %v1192_v54  ;;  %3311 = vmatpush3.msra.mxu0 %v1220_v55  ;;  %v1287_v52 = vld [vmem:[%s5472_s0 + $0x1248] sm:$0xff]  ;;  %v1258_v54 = vld [vmem:[%s5472_s0 + $0x1160] sm:$0xff] }
 0x113   :  { %3269 = vmatprep.subr.mxu1 %v1207_v56  ;;  %3312 = vmatprep.subr.mxu0 %v1235_v57  ;;  %v1286_v55 = vld [vmem:[%s5472_s0 + $0x1240] sm:$0xff]  ;;  %v1273_v56 = vld [vmem:[%s5472_s0 + $0x11d8] sm:$0xff] }
 0x114   :  { %3270 = vmatpush3.msra.mxu1 %v1191_v58  ;;  %3313 = vmatpush3.msra.mxu0 %v1219_v59  ;;  %v1257_v57 = vld [vmem:[%s5472_s0 + $0x1158] sm:$0xff]  ;;  %v1272_v59 = vld [vmem:[%s5472_s0 + $0x11d0] sm:$0xff] }
 0x115   :  { %3271 = vmatprep.subr.mxu1 %v1206_v60  ;;  %3314 = vmatprep.subr.mxu0 %v1234_v61  ;;  %v1285_v58 = vld [vmem:[%s5472_s0 + $0x1238] sm:$0xff]  ;;  %v1256_v60 = vld [vmem:[%s5472_s0 + $0x1150] sm:$0xff] }
 0x116   :  { %3272 = vmatpush3.msra.mxu1 %v1190_v62  ;;  %3315 = vmatpush3.msra.mxu0 %v1218_v63  ;;  %v1284_v61 = vld [vmem:[%s5472_s0 + $0x1230] sm:$0xff]  ;;  %v1271_v62 = vld [vmem:[%s5472_s0 + $0x11c8] sm:$0xff] }
 0x117   :  { %3273 = vmatprep.subr.mxu1 %v1205_v1  ;;  %3316 = vmatprep.subr.mxu0 %v1233_v2  ;;  %v1255_v63 = vld [vmem:[%s5472_s0 + $0x1148] sm:$0xff]  ;;  %v1270_v2 = vld [vmem:[%s5472_s0 + $0x11c0] sm:$0xff] }
 0x118   :  { %3274 = vmatpush3.msra.mxu1 %v1189_v3  ;;  %3317 = vmatpush3.msra.mxu0 %v1217_v4  ;;  %v1283_v1 = vld [vmem:[%s5472_s0 + $0x1228] sm:$0xff]  ;;  %v1254_v3 = vld [vmem:[%s5472_s0 + $0x1140] sm:$0xff] }
 0x119   :  { %3275 = vmatprep.subr.mxu1 %v1204_v6  ;;  %3318 = vmatprep.subr.mxu0 %v1232_v8  ;;  %v1282_v4 = vld [vmem:[%s5472_s0 + $0x1220] sm:$0xff]  ;;  %v1253_v6 = vld [vmem:[%s5472_s0 + $0x1138] sm:$0xff] }
 0x11a   :  { %3276 = vmatpush3.msra.mxu1 %v1188_v9  ;;  %3319 = vmatpush3.msra.mxu0 %v1216_v10  ;;  %v1281_v8 = vld [vmem:[%s5472_s0 + $0x1218] sm:$0xff]  ;;  %v1268_v9 = vld [vmem:[%s5472_s0 + $0x11b0] sm:$0xff]  ;;  %v618_v10 = vand.u32 127, %v21_v7  ;;  %v1251_v7 = vld [vmem:[%s5472_s0 + $0x1128] sm:$0xff] }
 0x11b   :  { %3277 = vmatprep.subr.mxu1 %v1203_v13  ;;  %3320 = vmatprep.subr.mxu0 %v1231_v14  ;;  %v1280_v13 = vld [vmem:[%s5472_s0 + $0x1210] sm:$0xff]  ;;  %v1267_v14 = vld [vmem:[%s5472_s0 + $0x11a8] sm:$0xff] }
 0x11c   :  { %3278 = vmatpush3.msra.mxu1 %v1187_v16  ;;  %3321 = vmatpush3.msra.mxu0 %v1215_v17  ;;  %v1266_v16 = vld [vmem:[%s5472_s0 + $0x11a0] sm:$0xff]  ;;  %v619_v17 = vadd.s32 4736, %v618_v10 }
 0x11d   :  { %3279 = vmatprep.subr.mxu1 %v1202_v18  ;;  %3322 = vmatprep.subr.mxu0 %v1230_v19  ;;  %v1250_v18 = vld [vmem:[%s5472_s0 + $0x1120] sm:$0xff] }
 0x11e   :  { %3280 = vmatpush3.msra.mxu1 %v1186_v21  ;;  %3323 = vmatpush3.msra.mxu0 %v1214_v22  ;;  %v1278_v19 = vld [vmem:[%s5472_s0 + $0x1200] sm:$0xff]  ;;  %v1265_v21 = vld [vmem:[%s5472_s0 + $0x1198] sm:$0xff]  ;;  %vm620_vm2 = vcmp.lt.s32.totalorder %v619_v17, 4781 }
 0x11f   :  { %3281 = vmatprep.subr.mxu1 %v1201_v24  ;;  %2497 = vmatprep.mubr.f32.mxu0 %v697_v23  ;;  %v2723_v22 = vld [vmem:[%s5475_s3 + $0x46] sm:$0x3]  ;;  %v1249_v23 = vld [vmem:[%s5472_s0 + $0x1118] sm:$0xff]  ;;  %v1299_v24 = vld [vmem:[%s5472_s0 + $0x12a8] sm:$0x1f] }
 0x120   :  { %2573 = vmatprep.subr.mxu0 %v3365_v32  ;;  %3282 = vmatpush3.msra.mxu1 %v1185_v25  ;;  %v2722_v25 = vld [vmem:[%s5475_s3 + $0x44] sm:$0x3] }
 0x121   :  { %2498 = vmatmul.mubr.f32.vlgmr.msra.gmra.mxu0 %v696_v26  ;;  %3283 = vmatprep.subr.mxu1 %v1200_v28  ;;  %v1264_v26 = vld [vmem:[%s5472_s0 + $0x1190] sm:$0xff] }
 0x122   :  { %2574 = vmatpush1.msra.mxu0 %v1293_v30  ;;  %3284 = vmatpush3.msra.mxu1 %v1184_v31  ;;  %v1248_v28 = vld [vmem:[%s5472_s0 + $0x1110] sm:$0xff]  ;;  %v584_v30 = vsel %vm24_vm0, %v2723_v22, %v3399_v0  ;;  %v1263_v31 = vld [vmem:[%s5472_s0 + $0x1188] sm:$0xff] }
 0x123   :  { %2575 = vmatprep.subr.mxu0 %v3365_v32  ;;  %3285 = vmatprep.subr.mxu1 %v1199_v33  ;;  %v568_v33 = vsel %vm24_vm0, %v2722_v25, %v3399_v0 }
 0x124   :  { %2576 = vmatpush1.msra.mxu0 %v1292_v35  ;;  %3286 = vmatpush3.msra.mxu1 %v1183_v36  ;;  %v1297_v35 = vld [vmem:[%s5472_s0 + $0x1298] sm:$0xff]  ;;  %v621_v36 = vsel %vm620_vm2, %v616_v27, %v3399_v0 }
 0x125   :  { %2577 = vmatprep.subr.mxu0 %v3365_v32  ;;  %3287 = vmatprep.subr.mxu1 %v1198_v38  ;;  %v699_v38 = vmax.f32 %v584_v30, 0.0 }
 0x126   :  { %2578 = vmatpush1.msra.mxu0 %v1291_v39  ;;  %3288 = vmatpush3.msra.mxu1 %v1182_v40  ;;  %v2724_v39 = vld [vmem:[%s5475_s3 + $0x48] sm:$0x3]  ;;  %v1246_v40 = vld [vmem:[%s5472_s0 + $0x1100] sm:$0xff] }
 0x127   :  { %2579 = vmatprep.subr.mxu0 %v3365_v32  ;;  %2427 = vmatprep.mubr.f32.mxu1 %v695_v41  ;;  %v698_v41 = vmax.f32 %v568_v33, 0.0 }
 0x128   :  { %2580 = vmatpush1.msra.mxu0 %v1290_v43  ;;  %2428 = vmatmul.mubr.f32.vlgmr.msra.gmra.mxu1 %v694_v42  ;;  %v1296_v42 = vld [vmem:[%s5472_s0 + $0x1290] sm:$0xff]  ;;  %v701_v43 = vmax.f32 %v621_v36, 0.0 }
 0x129   :  { %3327 = vmatprep.subr.mxu1 %v1277_v44  ;;  %2581 = vmatprep.subr.mxu0 %v3365_v32  ;;  %v600_v44 = vsel %vm24_vm0, %v2724_v39, %v3399_v0  ;;  %v2764_v0 = vpop.f32.mrf.mxu1 }
 0x12a   :  { %3328 = vmatpush3.msra.mxu1 %v1261_v45  ;;  %2582 = vmatpush1.msra.mxu0 %v1289_v46  ;;  %v1295_v45 = vld [vmem:[%s5472_s0 + $0x1288] sm:$0xff]  ;;  %v1294_v46 = vld [vmem:[%s5472_s0 + $0x1280] sm:$0xff] }
 0x12b   :  { %3329 = vmatprep.subr.mxu1 %v1276_v47  ;;  %2583 = vmatprep.subr.mxu0 %v3365_v32  ;;  %v700_v47 = vmax.f32 %v600_v44, 0.0  ;;  %v2765_v12 = vpop.f32.mrf.mxu1 }
 0x12c   :  { %3330 = vmatpush3.msra.mxu1 %v1260_v48  ;;  %2584 = vmatpush1.msra.mxu0 %v1288_v49 }
 0x12d   :  { %3331 = vmatprep.subr.mxu1 %v1275_v50  ;;  %2585 = vmatprep.subr.mxu0 %v3365_v32  ;;  %v2799_v48 = vpop.f32.mrf.mxu1  ;;  %v2766_v50 = vadd.f32 %v2765_v12, %v2764_v0 }
 0x12e   :  { %3332 = vmatpush3.msra.mxu1 %v1259_v51  ;;  %2586 = vmatpush1.msra.mxu0 %v1287_v52  ;;  %v2726_v51 = vld [vmem:[%s5473_s1] ss:$0 sm:$0xff]  ;;  %v2834_v52 = vpop.f32.mrf.mxu0 }
 0x12f   :  { %3333 = vmatprep.subr.mxu1 %v1274_v53  ;;  %2587 = vmatprep.subr.mxu0 %v3365_v32  ;;  %v2800_v49 = vpop.f32.mrf.mxu1 }
 0x130   :  { %3334 = vmatpush3.msra.mxu1 %v1258_v54  ;;  %2588 = vmatpush1.msra.mxu0 %v1286_v55  ;;  %v2801_v54 = vadd.f32 %v2800_v49, %v2799_v48  ;;  %v1380_v55 = vadd.f32 %v2766_v50, %v2726_v51 }
 0x131   :  { %3335 = vmatprep.subr.mxu1 %v1273_v56  ;;  %2589 = vmatprep.subr.mxu0 %v3365_v32  ;;  %v2869_v53 = vpop.f32.mrf.mxu1  ;;  %v2835_v56 = vpop.f32.mrf.mxu0 }
 0x132   :  { %3336 = vmatpush3.msra.mxu1 %v1257_v57  ;;  %2590 = vmatpush1.msra.mxu0 %v1285_v58  ;;  %v1450_v58 = vadd.f32 %v2801_v54, %v1380_v55 }
 0x133   :  { %3337 = vmatprep.subr.mxu1 %v1272_v59  ;;  %2591 = vmatprep.subr.mxu0 %v3365_v32  ;;  %v2870_v57 = vpop.f32.mrf.mxu1  ;;  %v2904_v59 = vpop.f32.mrf.mxu0 }
 0x134   :  { %3338 = vmatpush3.msra.mxu1 %v1256_v60  ;;  %2592 = vmatpush1.msra.mxu0 %v1284_v61  ;;  %v2836_v60 = vadd.f32 %v2835_v56, %v2834_v52  ;;  %v2871_v61 = vadd.f32 %v2870_v57, %v2869_v53 }
 0x135   :  { %3339 = vmatprep.subr.mxu1 %v1271_v62  ;;  %2593 = vmatprep.subr.mxu0 %v3365_v32 }
 0x136   :  { %3340 = vmatpush3.msra.mxu1 %v1255_v63  ;;  %2594 = vmatpush1.msra.mxu0 %v1283_v1  ;;  %v1520_v62 = vadd.f32 %v2836_v60, %v1450_v58  ;;  %v2905_v63 = vpop.f32.mrf.mxu0 }
 0x137   :  { %3341 = vmatprep.subr.mxu1 %v1270_v2  ;;  %2595 = vmatprep.subr.mxu0 %v3365_v32 }
 0x138   :  { %3342 = vmatpush3.msra.mxu1 %v1254_v3  ;;  %2596 = vmatpush1.msra.mxu0 %v1282_v4  ;;  %v1590_v2 = vadd.f32 %v2871_v61, %v1520_v62  ;;  %v2974_v3 = vpop.f32.mrf.mxu0 }
 0x139   :  { %3343 = vmatprep.subr.mxu1 %v1269_v5  ;;  %2597 = vmatprep.subr.mxu0 %v3365_v32  ;;  %v2906_v5 = vadd.f32 %v2905_v63, %v2904_v59 }
 0x13a   :  { %3344 = vmatpush3.msra.mxu1 %v1253_v6  ;;  %2598 = vmatpush1.msra.mxu0 %v1281_v8 }
 0x13b   :  { %3345 = vmatprep.subr.mxu1 %v1268_v9  ;;  %2599 = vmatprep.subr.mxu0 %v3365_v32  ;;  %v1660_v8 = vadd.f32 %v2906_v5, %v1590_v2  ;;  %v2975_v9 = vpop.f32.mrf.mxu0  ;;  %v2729_v5 = vld [vmem:[%s5473_s1 + $0x1] ss:$0 sm:$0xff] }
 0x13c   :  { %3346 = vmatpush3.msra.mxu1 %v1252_v11  ;;  %2600 = vmatpush1.msra.mxu0 %v1280_v13 }
 0x13d   :  { %3347 = vmatprep.subr.mxu1 %v1267_v14  ;;  %2601 = vmatprep.subr.mxu0 %v3365_v32 }
 0x13e   :  { %3348 = vmatpush3.msra.mxu1 %v1251_v7  ;;  %2602 = vmatpush1.msra.mxu0 %v1279_v15  ;;  %v2976_v7 = vadd.f32 %v2975_v9, %v2974_v3 }
 0x13f   :  { %3349 = vmatprep.subr.mxu1 %v1266_v16  ;;  %2603 = vmatprep.subr.mxu0 %v3365_v32 }
 0x140   :  { %3350 = vmatpush3.msra.mxu1 %v1250_v18  ;;  %2604 = vmatpush1.msra.mxu0 %v1278_v19 }
 0x141   :  { %3351 = vmatprep.subr.mxu1 %v1265_v21  ;;  %2625 = vmatprep.subr.mxu0 %v3365_v32 }
 0x142   :  { %3352 = vmatpush3.msra.mxu1 %v1249_v23  ;;  %2727 = vmatpush2.msk.msra.mxu0 %vm1309_vm1, %v1299_v24 }
 0x143   :  { %3353 = vmatprep.subr.mxu1 %v1264_v26  ;;  %2627 = vmatprep.subr.mxu0 %v3365_v32 }
 0x144   :  { %3354 = vmatpush3.msra.mxu1 %v1248_v28  ;;  %2628 = vmatpush2.msra.mxu0 %v1298_v29 }
 0x145   :  { %3355 = vmatprep.subr.mxu1 %v1263_v31  ;;  %2629 = vmatprep.subr.mxu0 %v3365_v32 }
 0x146   :  { %3356 = vmatpush3.msra.mxu1 %v1247_v34  ;;  %2630 = vmatpush2.msra.mxu0 %v1297_v35 }
 0x147   :  { %3357 = vmatprep.subr.mxu1 %v1262_v37  ;;  %2631 = vmatprep.subr.mxu0 %v3365_v32 }
 0x148   :  { %3358 = vmatpush3.msra.mxu1 %v1246_v40  ;;  %2567 = vmatprep.mubr.f32.mxu1 %v699_v38 }
 0x149   :  { %2632 = vmatpush2.msra.mxu0 %v1296_v42  ;;  %2568 = vmatmul.mubr.f32.vlgmr.msra.gmra.mxu1 %v698_v41 }
 0x14a   :  { %2633 = vmatprep.subr.mxu0 %v3365_v32  ;;  %2728 = vmatprep.mubr.msk.f32.mxu0 %vm1305_vm3, %v701_v43 }
 0x14b   :  { %2634 = vmatpush2.msra.mxu0 %v1295_v45 }
 0x14c   :  { %2635 = vmatprep.subr.mxu0 %v3365_v32  ;;  %v2939_v32 = vpop.f32.mrf.mxu1 }
 0x14d   :  { %2636 = vmatpush2.msra.mxu0 %v1294_v46 }
 0x14e   :  { %2638 = vmatmul.mubr.f32.vlgmr.msra.gmra.mxu0 %v700_v47  ;;  %v2940_v1 = vpop.f32.mrf.mxu1 }
 0x14f   :  { %v2941_v6 = vadd.f32 %v2940_v1, %v2939_v32 }
 0x151   :  { %v1730_v11 = vadd.f32 %v2941_v6, %v1660_v8  ;;  %v2730_v8 = vld [vmem:[%s5473_s1 + $0x2] ss:$0 sm:$0xff] }
 0x153   :  { %v1800_v16 = vadd.f32 %v2976_v7, %v1730_v11  ;;  %v2681_v7 = vstv %s5474_s2 }
 0x156   :  { %v3044_v13 = vpop.f32.mrf.mxu0 }
 0x158   :  { %v3045_v17 = vpop.f32.mrf.mxu0 }
 0x159   :  { %v3046_v22 = vadd.f32 %v3045_v17, %v3044_v13 }
 0x162   :  { %v3009_v4 = vpop.f32.mrf.mxu1 }
 0x164   :  { %v3010_v10 = vpop.f32.mrf.mxu1 }
 0x165   :  { %v3011_v15 = vadd.f32 %v3010_v10, %v3009_v4  ;;  %v2731_v10 = vld [vmem:[%s5473_s1 + $0x3] ss:$0 sm:$0xff] }
 0x167   :  { %v1870_v19 = vadd.f32 %v3011_v15, %v1800_v16 }
 0x169   :  { %v1940_v24 = vadd.f32 %v3046_v22, %v1870_v19 }
 0x17a   :  { %v3114_v20 = vpop.f32.mrf.mxu0 }
 0x17c   :  { %v3115_v25 = vpop.f32.mrf.mxu0 }
 0x17d   :  { %v3116_v30 = vadd.f32 %v3115_v25, %v3114_v20 }
 0x182   :  { %v3079_v14 = vpop.f32.mrf.mxu1 }
 0x184   :  { %v3080_v18 = vpop.f32.mrf.mxu1 }
 0x185   :  { %v3081_v23 = vadd.f32 %v3080_v18, %v3079_v14 }
 0x187   :  { %v2010_v27 = vadd.f32 %v3081_v23, %v1940_v24 }
 0x189   :  { %v2080_v33 = vadd.f32 %v3116_v30, %v2010_v27 }
 0x19d   :  { %v3184_v28 = vpop.f32.mrf.mxu0 }
 0x19f   :  { %v3185_v34 = vpop.f32.mrf.mxu0 }
 0x1a0   :  { %v3186_v39 = vadd.f32 %v3185_v34, %v3184_v28 }
 0x1a4   :  { %v3149_v21 = vpop.f32.mrf.mxu1 }
 0x1a6   :  { %v3150_v26 = vpop.f32.mrf.mxu1 }
 0x1a7   :  { %v3151_v31 = vadd.f32 %v3150_v26, %v3149_v21 }
 0x1a9   :  { %v2150_v36 = vadd.f32 %v3151_v31, %v2080_v33 }
 0x1ab   :  { %v2220_v41 = vadd.f32 %v3186_v39, %v2150_v36 }
 0x1bf   :  { %v3254_v37 = vpop.f32.mrf.mxu0 }
 0x1c1   :  { %v3255_v42 = vpop.f32.mrf.mxu0 }
 0x1c2   :  { %v3256_v46 = vadd.f32 %v3255_v42, %v3254_v37 }
 0x1c6   :  { %v3219_v29 = vpop.f32.mrf.mxu1 }
 0x1c8   :  { %v3220_v35 = vpop.f32.mrf.mxu1 }
 0x1c9   :  { %v3221_v40 = vadd.f32 %v3220_v35, %v3219_v29 }
 0x1cb   :  { %v2290_v44 = vadd.f32 %v3221_v40, %v2220_v41 }
 0x1cd   :  { %v2360_v0 = vadd.f32 %v3256_v46, %v2290_v44 }
 0x1e1   :  { %v3324_v45 = vpop.f32.mrf.mxu0 }
 0x1e3   :  { %v3325_v12 = vpop.f32.mrf.mxu0 }
 0x1e4   :  { %v3326_v50 = vadd.f32 %v3325_v12, %v3324_v45 }
 0x1e8   :  { %v3289_v38 = vpop.f32.mrf.mxu1 }
 0x1ea   :  { %v3290_v43 = vpop.f32.mrf.mxu1 }
 0x1eb   :  { %v3291_v47 = vadd.f32 %v3290_v43, %v3289_v38 }
 0x1ed   :  { %v2430_v48 = vadd.f32 %v3291_v47, %v2360_v0 }
 0x1ef   :  { %v2500_v53 = vadd.f32 %v3326_v50, %v2430_v48 }
 0x209   :  { %v3359_v49 = vpop.f32.mrf.mxu1 }
 0x20b   :  { %v3360_v51 = vpop.f32.mrf.mxu1 }
 0x20c   :  { %v3361_v52 = vadd.f32 %v3360_v51, %v3359_v49 }
 0x20e   :  { %v2570_v54 = vadd.f32 %v3361_v52, %v2500_v53  ;;  %v2639_v55 = vpop.f32.mrf.mxu0 }
 0x210   :  { %v2640_v56 = vadd.f32 %v2639_v55, %v2570_v54  ;;  %v2641_v57 = vpop.f32.mrf.mxu0 }
 0x212   :  { %v2643_v58 = vmax.f32 %v2640_v56, 0.0 }
 0x214   :  { %v2645_v59 = vsel %vm2644_vm4, %v2643_v58, 0.0 }
 0x215   :  { %2646 = vadd.xlane.f32.xlu0 %v2645_v59 }
 0x29e   :  { %v2647_v32 = vpop.xlane.xlu0 %2646 }
 0x29f   :  { %v2649_v60 = vmul.f32 0.015625, %v2647_v32 }
 0x2a1   :  { %v2650_v61 = vsub.f32 %v2643_v58, %v2649_v60 }
 0x2a3   :  { %v2651_v62 = vmul.f32 %v2650_v61, %v2650_v61 }
 0x2a5   :  { %v2652_v63 = vsel %vm2644_vm4, %v2651_v62, 0.0 }
 0x2a6   :  { %2653 = vadd.xlane.f32.xlu0 %v2652_v63 }
 0x32f   :  { %v2654_v1 = vpop.xlane.xlu0 %2653 }
 0x330   :  { %v2655_v2 = vmul.f32 0.015625, %v2654_v1 }
 0x332   :  { %v2656_v3 = vadd.f32 1e-05, %v2655_v2 }
 0x334   :  { %3363 = vrsqrt.f32 %v2656_v3 }
 0x341   :  { %v3364_v4 = vpop.eup %3363 }
 0x342   :  { %v2658_v6 = vmul.f32 %v3364_v4, %v2650_v61 }
 0x344   :  { %v2664_v9 = vmul.f32 %v2729_v5, %v2658_v6 }
 0x346   :  { %v2670_v11 = vadd.f32 %v2730_v8, %v2664_v9 }
 0x348   :  { %v2676_v13 = vmul.f32 %v2731_v10, %v2670_v11 }
 0x34a   :  { %v2677_v14 = vsel %vm2644_vm4, %v2676_v13, 0.0 }
 0x34b   :  { %2678 = vadd.xlane.f32.xlu1 %v2677_v14 }
 0x3d4   :  { %v2679_v15 = vpop.xlane.xlu1 %2678 }
 0x3d5   :  { %v2682_v16 = vadd.f32 %v2681_v7, %v2679_v15 }
 0x3d7   :  { %2684 = vst.msk [vmem:[%s5477_s5] sm:$0xff] %vm2683_vm5, %v2682_v16 }

</bundles_post_ra>
